<compile_context>
chip_gen: v6e
topology: v6e:2x2x1
jax: 0.10.0
libtpu: 0.0.40
codegen_flags: <defaults>
</compile_context>

<pallas_src>
import functools

import jax
import jax.numpy as jnp
from jax.experimental import pallas as pl
from jax.experimental.pallas import tpu as pltpu


_MXU_MIN_K = 128   # contraction size below which the 1x1 convs stay on the VPU


def _round_up(x, m):
    return -(-x // m) * m


# ----------------------------- kernel helpers -------------------------------- #

def _cumsum_pair_lanes(a, b, t_pad):
    """Inclusive prefix sums of two (1, t_pad) rows along the lane axis.

    Register-resident Hillis-Steele scan: ceil(log2(t_pad)) steps, each an
    XLU roll plus a masked VPU add (no VMEM round trips)."""
    lane = jax.lax.broadcasted_iota(jnp.int32, a.shape, 1)
    d = 1
    while d < t_pad:
        ra = pltpu.roll(a, shift=d, axis=1)
        rb = pltpu.roll(b, shift=d, axis=1)
        keep = lane >= d
        a = a + jnp.where(keep, ra, 0.0)
        b = b + jnp.where(keep, rb, 0.0)
        d *= 2
    return a, b


def _new_normal(y, gains, bias, inv_divid, t_pad, eps):
    """`newNormal` on an (H, t_pad) slab (valid lanes form a causal prefix).

    gains/bias are (H, 1).  Note: the PyTorch module hard-codes the divisor
    512*(t+1), NOT num_features."""
    s1 = jnp.sum(y, axis=0, keepdims=True)          # (1, T) channel sum
    s2 = jnp.sum(y * y, axis=0, keepdims=True)      # (1, T) channel sum of squares
    cum1, cum2 = _cumsum_pair_lanes(s1, s2, t_pad)
    mean = cum1 * inv_divid
    mean_pow = cum2 * inv_divid
    var = jnp.maximum(mean_pow - mean * mean, 0.0)  # guard f32 cancellation
    inv_std = jax.lax.rsqrt(var + eps)              # EUP rsqrt, no divide
    return (y - mean) * inv_std * gains + bias


def _conv1x1(w, x, b):
    """kernel_size=1 Conv1d on a (K, T) slab: (O, K) @ (K, T) + (O, 1).

    Tiny contractions stay on the VPU as K broadcast FMAs (the MXU would be
    a few-% utilized and still pay push/pop latency); contractions >= 128
    (real Conv-TasNet sizes) go to the MXU with an f32 accumulator."""
    _, k_dim = w.shape
    if k_dim < _MXU_MIN_K:
        acc = b
        for c in range(k_dim):                       # static, unrolled FMAs
            acc = acc + w[:, c:c + 1] * x[c:c + 1, :]
        return acc
    return jnp.dot(w, x, preferred_element_type=jnp.float32) + b


def _depthwise3(y, wd_ref, bd, lane, dilation, padding, t_valid, t_pad):
    """Depthwise k=3 Conv1d with zero padding: rolled taps + static edge masks.

    The Conv1d zero padding is emulated by masking, so no padded VMEM scratch
    is needed; tap shifts are XLU rolls and the FMAs stay on the VPU."""
    acc = bd
    for k in range(3):                               # static, unrolled taps
        s = padding - k * dilation                   # right-shift of tap k
        shift = s % t_pad
        tap = pltpu.roll(y, shift=shift, axis=1) if shift else y
        valid = (lane >= s) & (lane < t_valid + s)   # source index in [0, t_valid)
        acc = acc + wd_ref[k] * jnp.where(valid, tap, 0.0)
    return acc


# ----------------------------- Pallas kernel -------------------------------- #

def depth_conv_kernel(x_ref, w1_ref, b1_ref, a1_ref, g1_ref, be1_ref,
                      wd_ref, bd_ref, a2_ref, g2_ref, be2_ref,
                      wo_ref, bo_ref, o_ref, *,
                      dilation, padding, t_valid, t_pad, eps=1e-8):
    x = x_ref[0]                                     # (C_in, T_pad)
    h = w1_ref.shape[0]

    # Grid-invariant lane math, hoisted and shared by both newNormal calls.
    lane_row = jax.lax.broadcasted_iota(jnp.int32, (1, t_pad), 1)
    lane_full = jax.lax.broadcasted_iota(jnp.int32, (h, t_pad), 1)
    t_idx = lane_row.astype(jnp.float32)
    inv_divid = 1.0 / (512.0 * (t_idx + 1.0))        # exact, once per grid step

    # --- conv1: kernel_size=1 conv -> PReLU #1 -> newNormal #1 ----------------
    y = _conv1x1(w1_ref[...], x, b1_ref[...])
    a1 = a1_ref[0]                                   # SMEM scalar
    y = jnp.where(y > 0, y, a1 * y)
    y = _new_normal(y, g1_ref[...], be1_ref[...], inv_divid, t_pad, eps)

    # --- depthwise conv (k=3, groups=H) -> PReLU #2 -> newNormal #2 -----------
    z = _depthwise3(y, wd_ref, bd_ref[...], lane_full, dilation, padding,
                    t_valid, t_pad)
    a2 = a2_ref[0]                                   # SMEM scalar
    z = jnp.where(z > 0, z, a2 * z)
    z = _new_normal(z, g2_ref[...], be2_ref[...], inv_divid, t_pad, eps)

    # --- output: kernel_size=1 conv (lane-dense store) ------------------------
    o_ref[0] = _conv1x1(wo_ref[...], z, bo_ref[...])


# ----------------------------- wrapper --------------------------------------- #

def depth_conv_forward(x, params, *, dilation=1, padding=1):
    (w1, b1, a1, g1, be1, wd, bd, a2, g2, be2, wo, bo) = params
    B, C_in, T = x.shape
    H = w1.shape[0]
    C_out = wo.shape[0]
    T_out = T + 2 * padding - 2 * dilation           # Conv1d output length
    assert T_out >= 1

    # Lane-dense internal length: multiple of 128 so output stores are unmasked
    # vst's and all rolls act on aligned lane extents.  Extra lanes only hold
    # causal garbage (cumsums are causal) and are sliced off below.
    T_pad = _round_up(max(T, T_out), 128)
    if T_pad != T:
        x = jnp.pad(x, ((0, 0), (0, 0), (0, T_pad - T)))

    def full2(shape):
        return pl.BlockSpec(shape, lambda b: (0, 0))

    smem_scalar = pl.BlockSpec(memory_space=pltpu.MemorySpace.SMEM)

    in_specs = [
        pl.BlockSpec((1, C_in, T_pad), lambda b: (b, 0, 0)),   # x
        full2((H, C_in)),                                      # conv1 weight
        full2((H, 1)),                                         # conv1 bias
        smem_scalar,                                           # PReLU1 alpha (SMEM)
        full2((H, 1)),                                         # normal1 gains
        full2((H, 1)),                                         # normal1 bias
        pl.BlockSpec((3, H, 1), lambda b: (0, 0, 0)),          # depthwise weight
        full2((H, 1)),                                         # depthwise bias
        smem_scalar,                                           # PReLU2 alpha (SMEM)
        full2((H, 1)),                                         # normal2 gains
        full2((H, 1)),                                         # normal2 bias
        full2((C_out, H)),                                     # output weight
        full2((C_out, 1)),                                     # output bias
    ]
    out_spec = pl.BlockSpec((1, C_out, T_pad), lambda b: (b, 0, 0))

    kernel = functools.partial(depth_conv_kernel, dilation=dilation,
                               padding=padding, t_valid=T, t_pad=T_pad)
    out = pl.pallas_call(
        kernel,
        out_shape=jax.ShapeDtypeStruct((B, C_out, T_pad), jnp.float32),
        grid_spec=pltpu.PrefetchScalarGridSpec(
            num_scalar_prefetch=0,
            grid=(B,),
            in_specs=in_specs,
            out_specs=out_spec,
        ),
        compiler_params=pltpu.CompilerParams(
            dimension_semantics=("parallel",),        # batch-parallel (2 TCs on v7x)
            vmem_limit_bytes=32 * 1024 * 1024),
    )(x, w1, b1, a1, g1, be1, wd, bd, a2, g2, be2, wo, bo)
    return out[:, :, :T_out]


# ----------------------------- pure-JAX reference ---------------------------- #

def _new_normal_ref(x, gains, bias, eps=1e-8):
    T = x.shape[-1]
    divid = 512.0 * (jnp.arange(T, dtype=jnp.float32) + 1.0)
    mean = jnp.cumsum(x.sum(1), axis=1) / divid
    mean_pow = jnp.cumsum((x * x).sum(1), axis=1) / divid
    var = mean_pow - mean ** 2
    xn = (x - mean[:, None, :]) / jnp.sqrt(var[:, None, :] + eps)
    return xn * gains[None] + bias[None]


def depth_conv_ref(x, params, *, dilation=1, padding=1):
    (w1, b1, a1, g1, be1, wd, bd, a2, g2, be2, wo, bo) = params
    B, _, T = x.shape
    H = w1.shape[0]
    T_out = T + 2 * padding - 2 * dilation
    prelu = lambda v, a: jnp.where(v > 0, v, a * v)
    hi = jax.lax.Precision.HIGHEST
    y = jnp.einsum('oi,bit->bot', w1, x, precision=hi) + b1[None]
    y = _new_normal_ref(prelu(y, a1[0]), g1, be1)
    xp = jnp.pad(y, ((0, 0), (0, 0), (padding, padding)))
    acc = jnp.zeros((B, H, T_out), jnp.float32) + bd[None]
    for k in range(3):
        off = k * dilation
        acc = acc + wd[k][None] * xp[:, :, off:off + T_out]
    z = _new_normal_ref(prelu(acc, a2[0]), g2, be2)
    return jnp.einsum('oh,bht->bot', wo, z, precision=hi) + bo[None]


# ----------------------------- main ------------------------------------------ #

if __name__ == "__main__":
    # T chosen as a multiple of 128 so the kernel's lane-dense / aligned path
    # (the one intended for real Conv-TasNet sequence lengths) is exercised.
    B, C_in, H, C_out, T = 2, 4, 32, 6, 128
    dilation, padding = 1, 1

    key = jax.random.PRNGKey(0)
    ks = jax.random.split(key, 8)
    w1 = 0.3 * jax.random.normal(ks[0], (H, C_in), jnp.float32)
    b1 = 0.1 * jax.random.normal(ks[1], (H, 1), jnp.float32)
    a1 = jnp.full((1,), 0.25, jnp.float32)            # nn.PReLU() default init
    g1 = jnp.ones((H, 1), jnp.float32)                # newNormal gains init
    be1 = jnp.zeros((H, 1), jnp.float32)              # newNormal bias init
    wd = 0.3 * jax.random.normal(ks[2], (3, H, 1), jnp.float32)  # depthwise taps
    bd = 0.1 * jax.random.normal(ks[3], (H, 1), jnp.float32)
    a2 = jnp.full((1,), 0.25, jnp.float32)
    g2 = jnp.ones((H, 1), jnp.float32)
    be2 = jnp.zeros((H, 1), jnp.float32)
    wo = 0.3 * jax.random.normal(ks[4], (C_out, H), jnp.float32)
    bo = 0.1 * jax.random.normal(ks[5], (C_out, 1), jnp.float32)
    params = (w1, b1, a1, g1, be1, wd, bd, a2, g2, be2, wo, bo)

    x = jax.random.normal(ks[6], (B, C_in, T), jnp.float32)

    out = jax.block_until_ready(
        depth_conv_forward(x, params, dilation=dilation, padding=padding))
    ref = depth_conv_ref(x, params, dilation=dilation, padding=padding)

    T_out = T + 2 * padding - 2 * dilation
    assert out.shape == (B, C_out, T_out), out.shape
    assert bool(jnp.isfinite(out).all())
    rel = float(jnp.max(jnp.abs(out - ref)) / (jnp.max(jnp.abs(ref)) + 1e-6))
    assert rel < 1e-2, f"max relative error too large: {rel}"
    print("KERNEL_OK")
</pallas_src>

<mosaic_0001>
module attributes {stable_mosaic.version = 11 : i64} {
  func.func @depth_conv_kernel(%arg0: i32, %arg1: memref<1x4x128xf32, #tpu.memory_space<vmem>>, %arg2: memref<32x4xf32, #tpu.memory_space<vmem>>, %arg3: memref<32x1xf32, #tpu.memory_space<vmem>>, %arg4: memref<1xf32, #tpu.memory_space<smem>>, %arg5: memref<32x1xf32, #tpu.memory_space<vmem>>, %arg6: memref<32x1xf32, #tpu.memory_space<vmem>>, %arg7: memref<3x32x1xf32, #tpu.memory_space<vmem>>, %arg8: memref<32x1xf32, #tpu.memory_space<vmem>>, %arg9: memref<1xf32, #tpu.memory_space<smem>>, %arg10: memref<32x1xf32, #tpu.memory_space<vmem>>, %arg11: memref<32x1xf32, #tpu.memory_space<vmem>>, %arg12: memref<6x32xf32, #tpu.memory_space<vmem>>, %arg13: memref<6x1xf32, #tpu.memory_space<vmem>>, %arg14: memref<1x6x128xf32, #tpu.memory_space<vmem>>) attributes {dimension_semantics = [#tpu.dimension_semantics<parallel>], iteration_bounds = array<i64: 2>, scalar_prefetch = 0 : i64, scratch_operands = 0 : i64, tpu.core_type = #tpu.core_type<tc>, window_params = [{transform_indices = @transform_0, window_bounds = array<i64: 1, 4, 128>}, {pipeline_mode = #tpu.pipeline_mode<synchronous>, transform_indices = @transform_1, window_bounds = array<i64: 32, 4>}, {pipeline_mode = #tpu.pipeline_mode<synchronous>, transform_indices = @transform_2, window_bounds = array<i64: 32, 1>}, {transform_indices = @transform_3, window_bounds = array<i64: 1>}, {pipeline_mode = #tpu.pipeline_mode<synchronous>, transform_indices = @transform_4, window_bounds = array<i64: 32, 1>}, {pipeline_mode = #tpu.pipeline_mode<synchronous>, transform_indices = @transform_5, window_bounds = array<i64: 32, 1>}, {pipeline_mode = #tpu.pipeline_mode<synchronous>, transform_indices = @transform_6, window_bounds = array<i64: 3, 32, 1>}, {pipeline_mode = #tpu.pipeline_mode<synchronous>, transform_indices = @transform_7, window_bounds = array<i64: 32, 1>}, {transform_indices = @transform_8, window_bounds = array<i64: 1>}, {pipeline_mode = #tpu.pipeline_mode<synchronous>, transform_indices = @transform_9, window_bounds = array<i64: 32, 1>}, {pipeline_mode = #tpu.pipeline_mode<synchronous>, transform_indices = @transform_10, window_bounds = array<i64: 32, 1>}, {pipeline_mode = #tpu.pipeline_mode<synchronous>, transform_indices = @transform_11, window_bounds = array<i64: 6, 32>}, {pipeline_mode = #tpu.pipeline_mode<synchronous>, transform_indices = @transform_12, window_bounds = array<i64: 6, 1>}, {transform_indices = @transform_13, window_bounds = array<i64: 1, 6, 128>}]} {
    %c0 = arith.constant 0 : index
    %c0_0 = arith.constant 0 : index
    %c0_1 = arith.constant 0 : index
    %0 = vector.load %arg1[%c0, %c0_0, %c0_1] : memref<1x4x128xf32, #tpu.memory_space<vmem>>, vector<1x4x128xf32>
    %1 = vector.shape_cast %0 : vector<1x4x128xf32> to vector<4x128xf32>
    %2 = tpu.iota {dimensions = array<i32: 1>} : vector<1x128xi32>
    %3 = tpu.iota {dimensions = array<i32: 1>} : vector<32x128xi32>
    %4 = arith.sitofp %2 : vector<1x128xi32> to vector<1x128xf32>
    %cst = arith.constant 1.000000e+00 : f32
    %5 = vector.broadcast %cst : f32 to vector<1x128xf32>
    %6 = arith.addf %4, %5 : vector<1x128xf32>
    %cst_2 = arith.constant 5.120000e+02 : f32
    %7 = vector.broadcast %cst_2 : f32 to vector<1x128xf32>
    %8 = arith.mulf %7, %6 : vector<1x128xf32>
    %cst_3 = arith.constant 1.000000e+00 : f32
    %9 = vector.broadcast %cst_3 : f32 to vector<1x128xf32>
    %10 = arith.divf %9, %8 : vector<1x128xf32>
    %c0_4 = arith.constant 0 : index
    %c0_5 = arith.constant 0 : index
    %11 = vector.load %arg2[%c0_4, %c0_5] : memref<32x4xf32, #tpu.memory_space<vmem>>, vector<32x4xf32>
    %c0_6 = arith.constant 0 : index
    %c0_7 = arith.constant 0 : index
    %12 = vector.load %arg3[%c0_6, %c0_7] : memref<32x1xf32, #tpu.memory_space<vmem>>, vector<32x1xf32>
    %13 = vector.extract_strided_slice %11 {offsets = [0, 0], sizes = [32, 1], strides = [1, 1]} : vector<32x4xf32> to vector<32x1xf32>
    %14 = vector.extract_strided_slice %1 {offsets = [0, 0], sizes = [1, 128], strides = [1, 1]} : vector<4x128xf32> to vector<1x128xf32>
    %15 = vector.broadcast %13 : vector<32x1xf32> to vector<32x128xf32>
    %16 = vector.broadcast %14 : vector<1x128xf32> to vector<32x128xf32>
    %17 = arith.mulf %15, %16 : vector<32x128xf32>
    %18 = vector.broadcast %12 : vector<32x1xf32> to vector<32x128xf32>
    %19 = arith.addf %18, %17 : vector<32x128xf32>
    %20 = vector.extract_strided_slice %11 {offsets = [0, 1], sizes = [32, 1], strides = [1, 1]} : vector<32x4xf32> to vector<32x1xf32>
    %21 = vector.extract_strided_slice %1 {offsets = [1, 0], sizes = [1, 128], strides = [1, 1]} : vector<4x128xf32> to vector<1x128xf32>
    %22 = vector.broadcast %20 : vector<32x1xf32> to vector<32x128xf32>
    %23 = vector.broadcast %21 : vector<1x128xf32> to vector<32x128xf32>
    %24 = arith.mulf %22, %23 : vector<32x128xf32>
    %25 = arith.addf %19, %24 : vector<32x128xf32>
    %26 = vector.extract_strided_slice %11 {offsets = [0, 2], sizes = [32, 1], strides = [1, 1]} : vector<32x4xf32> to vector<32x1xf32>
    %27 = vector.extract_strided_slice %1 {offsets = [2, 0], sizes = [1, 128], strides = [1, 1]} : vector<4x128xf32> to vector<1x128xf32>
    %28 = vector.broadcast %26 : vector<32x1xf32> to vector<32x128xf32>
    %29 = vector.broadcast %27 : vector<1x128xf32> to vector<32x128xf32>
    %30 = arith.mulf %28, %29 : vector<32x128xf32>
    %31 = arith.addf %25, %30 : vector<32x128xf32>
    %32 = vector.extract_strided_slice %11 {offsets = [0, 3], sizes = [32, 1], strides = [1, 1]} : vector<32x4xf32> to vector<32x1xf32>
    %33 = vector.extract_strided_slice %1 {offsets = [3, 0], sizes = [1, 128], strides = [1, 1]} : vector<4x128xf32> to vector<1x128xf32>
    %34 = vector.broadcast %32 : vector<32x1xf32> to vector<32x128xf32>
    %35 = vector.broadcast %33 : vector<1x128xf32> to vector<32x128xf32>
    %36 = arith.mulf %34, %35 : vector<32x128xf32>
    %37 = arith.addf %31, %36 : vector<32x128xf32>
    %c0_8 = arith.constant 0 : index
    %38 = memref.load %arg4[%c0_8] : memref<1xf32, #tpu.memory_space<smem>>
    %cst_9 = arith.constant 0.000000e+00 : f32
    %39 = vector.broadcast %cst_9 : f32 to vector<32x128xf32>
    %40 = arith.cmpf ogt, %37, %39 : vector<32x128xf32>
    %41 = vector.broadcast %38 : f32 to vector<32x128xf32>
    %42 = arith.mulf %41, %37 : vector<32x128xf32>
    %43 = arith.select %40, %37, %42 : vector<32x128xi1>, vector<32x128xf32>
    %c0_10 = arith.constant 0 : index
    %c0_11 = arith.constant 0 : index
    %44 = vector.load %arg5[%c0_10, %c0_11] : memref<32x1xf32, #tpu.memory_space<vmem>>, vector<32x1xf32>
    %c0_12 = arith.constant 0 : index
    %c0_13 = arith.constant 0 : index
    %45 = vector.load %arg6[%c0_12, %c0_13] : memref<32x1xf32, #tpu.memory_space<vmem>>, vector<32x1xf32>
    %cst_14 = arith.constant dense<0.000000e+00> : vector<128xf32>
    %46 = vector.multi_reduction <add>, %43, %cst_14 [0] : vector<32x128xf32> to vector<128xf32>
    %47 = vector.shape_cast %46 : vector<128xf32> to vector<1x128xf32>
    %48 = arith.mulf %43, %43 : vector<32x128xf32>
    %cst_15 = arith.constant dense<0.000000e+00> : vector<128xf32>
    %49 = vector.multi_reduction <add>, %48, %cst_15 [0] : vector<32x128xf32> to vector<128xf32>
    %50 = vector.shape_cast %49 : vector<128xf32> to vector<1x128xf32>
    %51 = tpu.iota {dimensions = array<i32: 1>} : vector<1x128xi32>
    %c1_i32 = arith.constant 1 : i32
    %52 = tpu.dynamic_rotate %47 by %c1_i32 dim 1 : vector<1x128xf32>, i32 -> vector<1x128xf32>
    %c1_i32_16 = arith.constant 1 : i32
    %53 = tpu.dynamic_rotate %50 by %c1_i32_16 dim 1 : vector<1x128xf32>, i32 -> vector<1x128xf32>
    %c1_i32_17 = arith.constant 1 : i32
    %54 = vector.broadcast %c1_i32_17 : i32 to vector<1x128xi32>
    %55 = arith.cmpi sge, %51, %54 : vector<1x128xi32>
    %cst_18 = arith.constant 0.000000e+00 : f32
    %56 = vector.broadcast %cst_18 : f32 to vector<1x128xf32>
    %57 = arith.select %55, %52, %56 : vector<1x128xi1>, vector<1x128xf32>
    %58 = arith.addf %47, %57 : vector<1x128xf32>
    %cst_19 = arith.constant 0.000000e+00 : f32
    %59 = vector.broadcast %cst_19 : f32 to vector<1x128xf32>
    %60 = arith.select %55, %53, %59 : vector<1x128xi1>, vector<1x128xf32>
    %61 = arith.addf %50, %60 : vector<1x128xf32>
    %c2_i32 = arith.constant 2 : i32
    %62 = tpu.dynamic_rotate %58 by %c2_i32 dim 1 : vector<1x128xf32>, i32 -> vector<1x128xf32>
    %c2_i32_20 = arith.constant 2 : i32
    %63 = tpu.dynamic_rotate %61 by %c2_i32_20 dim 1 : vector<1x128xf32>, i32 -> vector<1x128xf32>
    %c2_i32_21 = arith.constant 2 : i32
    %64 = vector.broadcast %c2_i32_21 : i32 to vector<1x128xi32>
    %65 = arith.cmpi sge, %51, %64 : vector<1x128xi32>
    %cst_22 = arith.constant 0.000000e+00 : f32
    %66 = vector.broadcast %cst_22 : f32 to vector<1x128xf32>
    %67 = arith.select %65, %62, %66 : vector<1x128xi1>, vector<1x128xf32>
    %68 = arith.addf %58, %67 : vector<1x128xf32>
    %cst_23 = arith.constant 0.000000e+00 : f32
    %69 = vector.broadcast %cst_23 : f32 to vector<1x128xf32>
    %70 = arith.select %65, %63, %69 : vector<1x128xi1>, vector<1x128xf32>
    %71 = arith.addf %61, %70 : vector<1x128xf32>
    %c4_i32 = arith.constant 4 : i32
    %72 = tpu.dynamic_rotate %68 by %c4_i32 dim 1 : vector<1x128xf32>, i32 -> vector<1x128xf32>
    %c4_i32_24 = arith.constant 4 : i32
    %73 = tpu.dynamic_rotate %71 by %c4_i32_24 dim 1 : vector<1x128xf32>, i32 -> vector<1x128xf32>
    %c4_i32_25 = arith.constant 4 : i32
    %74 = vector.broadcast %c4_i32_25 : i32 to vector<1x128xi32>
    %75 = arith.cmpi sge, %51, %74 : vector<1x128xi32>
    %cst_26 = arith.constant 0.000000e+00 : f32
    %76 = vector.broadcast %cst_26 : f32 to vector<1x128xf32>
    %77 = arith.select %75, %72, %76 : vector<1x128xi1>, vector<1x128xf32>
    %78 = arith.addf %68, %77 : vector<1x128xf32>
    %cst_27 = arith.constant 0.000000e+00 : f32
    %79 = vector.broadcast %cst_27 : f32 to vector<1x128xf32>
    %80 = arith.select %75, %73, %79 : vector<1x128xi1>, vector<1x128xf32>
    %81 = arith.addf %71, %80 : vector<1x128xf32>
    %c8_i32 = arith.constant 8 : i32
    %82 = tpu.dynamic_rotate %78 by %c8_i32 dim 1 : vector<1x128xf32>, i32 -> vector<1x128xf32>
    %c8_i32_28 = arith.constant 8 : i32
    %83 = tpu.dynamic_rotate %81 by %c8_i32_28 dim 1 : vector<1x128xf32>, i32 -> vector<1x128xf32>
    %c8_i32_29 = arith.constant 8 : i32
    %84 = vector.broadcast %c8_i32_29 : i32 to vector<1x128xi32>
    %85 = arith.cmpi sge, %51, %84 : vector<1x128xi32>
    %cst_30 = arith.constant 0.000000e+00 : f32
    %86 = vector.broadcast %cst_30 : f32 to vector<1x128xf32>
    %87 = arith.select %85, %82, %86 : vector<1x128xi1>, vector<1x128xf32>
    %88 = arith.addf %78, %87 : vector<1x128xf32>
    %cst_31 = arith.constant 0.000000e+00 : f32
    %89 = vector.broadcast %cst_31 : f32 to vector<1x128xf32>
    %90 = arith.select %85, %83, %89 : vector<1x128xi1>, vector<1x128xf32>
    %91 = arith.addf %81, %90 : vector<1x128xf32>
    %c16_i32 = arith.constant 16 : i32
    %92 = tpu.dynamic_rotate %88 by %c16_i32 dim 1 : vector<1x128xf32>, i32 -> vector<1x128xf32>
    %c16_i32_32 = arith.constant 16 : i32
    %93 = tpu.dynamic_rotate %91 by %c16_i32_32 dim 1 : vector<1x128xf32>, i32 -> vector<1x128xf32>
    %c16_i32_33 = arith.constant 16 : i32
    %94 = vector.broadcast %c16_i32_33 : i32 to vector<1x128xi32>
    %95 = arith.cmpi sge, %51, %94 : vector<1x128xi32>
    %cst_34 = arith.constant 0.000000e+00 : f32
    %96 = vector.broadcast %cst_34 : f32 to vector<1x128xf32>
    %97 = arith.select %95, %92, %96 : vector<1x128xi1>, vector<1x128xf32>
    %98 = arith.addf %88, %97 : vector<1x128xf32>
    %cst_35 = arith.constant 0.000000e+00 : f32
    %99 = vector.broadcast %cst_35 : f32 to vector<1x128xf32>
    %100 = arith.select %95, %93, %99 : vector<1x128xi1>, vector<1x128xf32>
    %101 = arith.addf %91, %100 : vector<1x128xf32>
    %c32_i32 = arith.constant 32 : i32
    %102 = tpu.dynamic_rotate %98 by %c32_i32 dim 1 : vector<1x128xf32>, i32 -> vector<1x128xf32>
    %c32_i32_36 = arith.constant 32 : i32
    %103 = tpu.dynamic_rotate %101 by %c32_i32_36 dim 1 : vector<1x128xf32>, i32 -> vector<1x128xf32>
    %c32_i32_37 = arith.constant 32 : i32
    %104 = vector.broadcast %c32_i32_37 : i32 to vector<1x128xi32>
    %105 = arith.cmpi sge, %51, %104 : vector<1x128xi32>
    %cst_38 = arith.constant 0.000000e+00 : f32
    %106 = vector.broadcast %cst_38 : f32 to vector<1x128xf32>
    %107 = arith.select %105, %102, %106 : vector<1x128xi1>, vector<1x128xf32>
    %108 = arith.addf %98, %107 : vector<1x128xf32>
    %cst_39 = arith.constant 0.000000e+00 : f32
    %109 = vector.broadcast %cst_39 : f32 to vector<1x128xf32>
    %110 = arith.select %105, %103, %109 : vector<1x128xi1>, vector<1x128xf32>
    %111 = arith.addf %101, %110 : vector<1x128xf32>
    %c64_i32 = arith.constant 64 : i32
    %112 = tpu.dynamic_rotate %108 by %c64_i32 dim 1 : vector<1x128xf32>, i32 -> vector<1x128xf32>
    %c64_i32_40 = arith.constant 64 : i32
    %113 = tpu.dynamic_rotate %111 by %c64_i32_40 dim 1 : vector<1x128xf32>, i32 -> vector<1x128xf32>
    %c64_i32_41 = arith.constant 64 : i32
    %114 = vector.broadcast %c64_i32_41 : i32 to vector<1x128xi32>
    %115 = arith.cmpi sge, %51, %114 : vector<1x128xi32>
    %cst_42 = arith.constant 0.000000e+00 : f32
    %116 = vector.broadcast %cst_42 : f32 to vector<1x128xf32>
    %117 = arith.select %115, %112, %116 : vector<1x128xi1>, vector<1x128xf32>
    %118 = arith.addf %108, %117 : vector<1x128xf32>
    %cst_43 = arith.constant 0.000000e+00 : f32
    %119 = vector.broadcast %cst_43 : f32 to vector<1x128xf32>
    %120 = arith.select %115, %113, %119 : vector<1x128xi1>, vector<1x128xf32>
    %121 = arith.addf %111, %120 : vector<1x128xf32>
    %122 = arith.mulf %118, %10 : vector<1x128xf32>
    %123 = arith.mulf %121, %10 : vector<1x128xf32>
    %124 = arith.mulf %122, %122 : vector<1x128xf32>
    %125 = arith.subf %123, %124 : vector<1x128xf32>
    %cst_44 = arith.constant 0.000000e+00 : f32
    %126 = vector.broadcast %cst_44 : f32 to vector<1x128xf32>
    %127 = arith.maximumf %125, %126 : vector<1x128xf32>
    %cst_45 = arith.constant 9.99999993E-9 : f32
    %128 = vector.broadcast %cst_45 : f32 to vector<1x128xf32>
    %129 = arith.addf %127, %128 : vector<1x128xf32>
    %130 = math.rsqrt %129 : vector<1x128xf32>
    %131 = vector.broadcast %122 : vector<1x128xf32> to vector<32x128xf32>
    %132 = arith.subf %43, %131 : vector<32x128xf32>
    %133 = vector.broadcast %130 : vector<1x128xf32> to vector<32x128xf32>
    %134 = arith.mulf %132, %133 : vector<32x128xf32>
    %135 = vector.broadcast %44 : vector<32x1xf32> to vector<32x128xf32>
    %136 = arith.mulf %134, %135 : vector<32x128xf32>
    %137 = vector.broadcast %45 : vector<32x1xf32> to vector<32x128xf32>
    %138 = arith.addf %136, %137 : vector<32x128xf32>
    %c0_46 = arith.constant 0 : index
    %c0_47 = arith.constant 0 : index
    %139 = vector.load %arg8[%c0_46, %c0_47] : memref<32x1xf32, #tpu.memory_space<vmem>>, vector<32x1xf32>
    %c1_i32_48 = arith.constant 1 : i32
    %140 = tpu.dynamic_rotate %138 by %c1_i32_48 dim 1 : vector<32x128xf32>, i32 -> vector<32x128xf32>
    %c1_i32_49 = arith.constant 1 : i32
    %141 = vector.broadcast %c1_i32_49 : i32 to vector<32x128xi32>
    %142 = arith.cmpi sge, %3, %141 : vector<32x128xi32>
    %c129_i32 = arith.constant 129 : i32
    %143 = vector.broadcast %c129_i32 : i32 to vector<32x128xi32>
    %144 = arith.cmpi slt, %3, %143 : vector<32x128xi32>
    %145 = arith.andi %142, %144 : vector<32x128xi1>
    %c0_50 = arith.constant 0 : index
    %c0_51 = arith.constant 0 : index
    %c0_52 = arith.constant 0 : index
    %146 = vector.load %arg7[%c0_50, %c0_51, %c0_52] : memref<3x32x1xf32, #tpu.memory_space<vmem>>, vector<1x32x1xf32>
    %147 = vector.shape_cast %146 : vector<1x32x1xf32> to vector<32x1xf32>
    %cst_53 = arith.constant 0.000000e+00 : f32
    %148 = vector.broadcast %cst_53 : f32 to vector<32x128xf32>
    %149 = arith.select %145, %140, %148 : vector<32x128xi1>, vector<32x128xf32>
    %150 = vector.broadcast %147 : vector<32x1xf32> to vector<32x128xf32>
    %151 = arith.mulf %150, %149 : vector<32x128xf32>
    %152 = vector.broadcast %139 : vector<32x1xf32> to vector<32x128xf32>
    %153 = arith.addf %152, %151 : vector<32x128xf32>
    %c0_i32 = arith.constant 0 : i32
    %154 = vector.broadcast %c0_i32 : i32 to vector<32x128xi32>
    %155 = arith.cmpi sge, %3, %154 : vector<32x128xi32>
    %c128_i32 = arith.constant 128 : i32
    %156 = vector.broadcast %c128_i32 : i32 to vector<32x128xi32>
    %157 = arith.cmpi slt, %3, %156 : vector<32x128xi32>
    %158 = arith.andi %155, %157 : vector<32x128xi1>
    %c1 = arith.constant 1 : index
    %c0_54 = arith.constant 0 : index
    %c0_55 = arith.constant 0 : index
    %159 = vector.load %arg7[%c1, %c0_54, %c0_55] : memref<3x32x1xf32, #tpu.memory_space<vmem>>, vector<1x32x1xf32>
    %160 = vector.shape_cast %159 : vector<1x32x1xf32> to vector<32x1xf32>
    %cst_56 = arith.constant 0.000000e+00 : f32
    %161 = vector.broadcast %cst_56 : f32 to vector<32x128xf32>
    %162 = arith.select %158, %138, %161 : vector<32x128xi1>, vector<32x128xf32>
    %163 = vector.broadcast %160 : vector<32x1xf32> to vector<32x128xf32>
    %164 = arith.mulf %163, %162 : vector<32x128xf32>
    %165 = arith.addf %153, %164 : vector<32x128xf32>
    %c127_i32 = arith.constant 127 : i32
    %166 = tpu.dynamic_rotate %138 by %c127_i32 dim 1 : vector<32x128xf32>, i32 -> vector<32x128xf32>
    %c-1_i32 = arith.constant -1 : i32
    %167 = vector.broadcast %c-1_i32 : i32 to vector<32x128xi32>
    %168 = arith.cmpi sge, %3, %167 : vector<32x128xi32>
    %c127_i32_57 = arith.constant 127 : i32
    %169 = vector.broadcast %c127_i32_57 : i32 to vector<32x128xi32>
    %170 = arith.cmpi slt, %3, %169 : vector<32x128xi32>
    %171 = arith.andi %168, %170 : vector<32x128xi1>
    %c2 = arith.constant 2 : index
    %c0_58 = arith.constant 0 : index
    %c0_59 = arith.constant 0 : index
    %172 = vector.load %arg7[%c2, %c0_58, %c0_59] : memref<3x32x1xf32, #tpu.memory_space<vmem>>, vector<1x32x1xf32>
    %173 = vector.shape_cast %172 : vector<1x32x1xf32> to vector<32x1xf32>
    %cst_60 = arith.constant 0.000000e+00 : f32
    %174 = vector.broadcast %cst_60 : f32 to vector<32x128xf32>
    %175 = arith.select %171, %166, %174 : vector<32x128xi1>, vector<32x128xf32>
    %176 = vector.broadcast %173 : vector<32x1xf32> to vector<32x128xf32>
    %177 = arith.mulf %176, %175 : vector<32x128xf32>
    %178 = arith.addf %165, %177 : vector<32x128xf32>
    %c0_61 = arith.constant 0 : index
    %179 = memref.load %arg9[%c0_61] : memref<1xf32, #tpu.memory_space<smem>>
    %cst_62 = arith.constant 0.000000e+00 : f32
    %180 = vector.broadcast %cst_62 : f32 to vector<32x128xf32>
    %181 = arith.cmpf ogt, %178, %180 : vector<32x128xf32>
    %182 = vector.broadcast %179 : f32 to vector<32x128xf32>
    %183 = arith.mulf %182, %178 : vector<32x128xf32>
    %184 = arith.select %181, %178, %183 : vector<32x128xi1>, vector<32x128xf32>
    %c0_63 = arith.constant 0 : index
    %c0_64 = arith.constant 0 : index
    %185 = vector.load %arg10[%c0_63, %c0_64] : memref<32x1xf32, #tpu.memory_space<vmem>>, vector<32x1xf32>
    %c0_65 = arith.constant 0 : index
    %c0_66 = arith.constant 0 : index
    %186 = vector.load %arg11[%c0_65, %c0_66] : memref<32x1xf32, #tpu.memory_space<vmem>>, vector<32x1xf32>
    %cst_67 = arith.constant dense<0.000000e+00> : vector<128xf32>
    %187 = vector.multi_reduction <add>, %184, %cst_67 [0] : vector<32x128xf32> to vector<128xf32>
    %188 = vector.shape_cast %187 : vector<128xf32> to vector<1x128xf32>
    %189 = arith.mulf %184, %184 : vector<32x128xf32>
    %cst_68 = arith.constant dense<0.000000e+00> : vector<128xf32>
    %190 = vector.multi_reduction <add>, %189, %cst_68 [0] : vector<32x128xf32> to vector<128xf32>
    %191 = vector.shape_cast %190 : vector<128xf32> to vector<1x128xf32>
    %192 = tpu.iota {dimensions = array<i32: 1>} : vector<1x128xi32>
    %c1_i32_69 = arith.constant 1 : i32
    %193 = tpu.dynamic_rotate %188 by %c1_i32_69 dim 1 : vector<1x128xf32>, i32 -> vector<1x128xf32>
    %c1_i32_70 = arith.constant 1 : i32
    %194 = tpu.dynamic_rotate %191 by %c1_i32_70 dim 1 : vector<1x128xf32>, i32 -> vector<1x128xf32>
    %c1_i32_71 = arith.constant 1 : i32
    %195 = vector.broadcast %c1_i32_71 : i32 to vector<1x128xi32>
    %196 = arith.cmpi sge, %192, %195 : vector<1x128xi32>
    %cst_72 = arith.constant 0.000000e+00 : f32
    %197 = vector.broadcast %cst_72 : f32 to vector<1x128xf32>
    %198 = arith.select %196, %193, %197 : vector<1x128xi1>, vector<1x128xf32>
    %199 = arith.addf %188, %198 : vector<1x128xf32>
    %cst_73 = arith.constant 0.000000e+00 : f32
    %200 = vector.broadcast %cst_73 : f32 to vector<1x128xf32>
    %201 = arith.select %196, %194, %200 : vector<1x128xi1>, vector<1x128xf32>
    %202 = arith.addf %191, %201 : vector<1x128xf32>
    %c2_i32_74 = arith.constant 2 : i32
    %203 = tpu.dynamic_rotate %199 by %c2_i32_74 dim 1 : vector<1x128xf32>, i32 -> vector<1x128xf32>
    %c2_i32_75 = arith.constant 2 : i32
    %204 = tpu.dynamic_rotate %202 by %c2_i32_75 dim 1 : vector<1x128xf32>, i32 -> vector<1x128xf32>
    %c2_i32_76 = arith.constant 2 : i32
    %205 = vector.broadcast %c2_i32_76 : i32 to vector<1x128xi32>
    %206 = arith.cmpi sge, %192, %205 : vector<1x128xi32>
    %cst_77 = arith.constant 0.000000e+00 : f32
    %207 = vector.broadcast %cst_77 : f32 to vector<1x128xf32>
    %208 = arith.select %206, %203, %207 : vector<1x128xi1>, vector<1x128xf32>
    %209 = arith.addf %199, %208 : vector<1x128xf32>
    %cst_78 = arith.constant 0.000000e+00 : f32
    %210 = vector.broadcast %cst_78 : f32 to vector<1x128xf32>
    %211 = arith.select %206, %204, %210 : vector<1x128xi1>, vector<1x128xf32>
    %212 = arith.addf %202, %211 : vector<1x128xf32>
    %c4_i32_79 = arith.constant 4 : i32
    %213 = tpu.dynamic_rotate %209 by %c4_i32_79 dim 1 : vector<1x128xf32>, i32 -> vector<1x128xf32>
    %c4_i32_80 = arith.constant 4 : i32
    %214 = tpu.dynamic_rotate %212 by %c4_i32_80 dim 1 : vector<1x128xf32>, i32 -> vector<1x128xf32>
    %c4_i32_81 = arith.constant 4 : i32
    %215 = vector.broadcast %c4_i32_81 : i32 to vector<1x128xi32>
    %216 = arith.cmpi sge, %192, %215 : vector<1x128xi32>
    %cst_82 = arith.constant 0.000000e+00 : f32
    %217 = vector.broadcast %cst_82 : f32 to vector<1x128xf32>
    %218 = arith.select %216, %213, %217 : vector<1x128xi1>, vector<1x128xf32>
    %219 = arith.addf %209, %218 : vector<1x128xf32>
    %cst_83 = arith.constant 0.000000e+00 : f32
    %220 = vector.broadcast %cst_83 : f32 to vector<1x128xf32>
    %221 = arith.select %216, %214, %220 : vector<1x128xi1>, vector<1x128xf32>
    %222 = arith.addf %212, %221 : vector<1x128xf32>
    %c8_i32_84 = arith.constant 8 : i32
    %223 = tpu.dynamic_rotate %219 by %c8_i32_84 dim 1 : vector<1x128xf32>, i32 -> vector<1x128xf32>
    %c8_i32_85 = arith.constant 8 : i32
    %224 = tpu.dynamic_rotate %222 by %c8_i32_85 dim 1 : vector<1x128xf32>, i32 -> vector<1x128xf32>
    %c8_i32_86 = arith.constant 8 : i32
    %225 = vector.broadcast %c8_i32_86 : i32 to vector<1x128xi32>
    %226 = arith.cmpi sge, %192, %225 : vector<1x128xi32>
    %cst_87 = arith.constant 0.000000e+00 : f32
    %227 = vector.broadcast %cst_87 : f32 to vector<1x128xf32>
    %228 = arith.select %226, %223, %227 : vector<1x128xi1>, vector<1x128xf32>
    %229 = arith.addf %219, %228 : vector<1x128xf32>
    %cst_88 = arith.constant 0.000000e+00 : f32
    %230 = vector.broadcast %cst_88 : f32 to vector<1x128xf32>
    %231 = arith.select %226, %224, %230 : vector<1x128xi1>, vector<1x128xf32>
    %232 = arith.addf %222, %231 : vector<1x128xf32>
    %c16_i32_89 = arith.constant 16 : i32
    %233 = tpu.dynamic_rotate %229 by %c16_i32_89 dim 1 : vector<1x128xf32>, i32 -> vector<1x128xf32>
    %c16_i32_90 = arith.constant 16 : i32
    %234 = tpu.dynamic_rotate %232 by %c16_i32_90 dim 1 : vector<1x128xf32>, i32 -> vector<1x128xf32>
    %c16_i32_91 = arith.constant 16 : i32
    %235 = vector.broadcast %c16_i32_91 : i32 to vector<1x128xi32>
    %236 = arith.cmpi sge, %192, %235 : vector<1x128xi32>
    %cst_92 = arith.constant 0.000000e+00 : f32
    %237 = vector.broadcast %cst_92 : f32 to vector<1x128xf32>
    %238 = arith.select %236, %233, %237 : vector<1x128xi1>, vector<1x128xf32>
    %239 = arith.addf %229, %238 : vector<1x128xf32>
    %cst_93 = arith.constant 0.000000e+00 : f32
    %240 = vector.broadcast %cst_93 : f32 to vector<1x128xf32>
    %241 = arith.select %236, %234, %240 : vector<1x128xi1>, vector<1x128xf32>
    %242 = arith.addf %232, %241 : vector<1x128xf32>
    %c32_i32_94 = arith.constant 32 : i32
    %243 = tpu.dynamic_rotate %239 by %c32_i32_94 dim 1 : vector<1x128xf32>, i32 -> vector<1x128xf32>
    %c32_i32_95 = arith.constant 32 : i32
    %244 = tpu.dynamic_rotate %242 by %c32_i32_95 dim 1 : vector<1x128xf32>, i32 -> vector<1x128xf32>
    %c32_i32_96 = arith.constant 32 : i32
    %245 = vector.broadcast %c32_i32_96 : i32 to vector<1x128xi32>
    %246 = arith.cmpi sge, %192, %245 : vector<1x128xi32>
    %cst_97 = arith.constant 0.000000e+00 : f32
    %247 = vector.broadcast %cst_97 : f32 to vector<1x128xf32>
    %248 = arith.select %246, %243, %247 : vector<1x128xi1>, vector<1x128xf32>
    %249 = arith.addf %239, %248 : vector<1x128xf32>
    %cst_98 = arith.constant 0.000000e+00 : f32
    %250 = vector.broadcast %cst_98 : f32 to vector<1x128xf32>
    %251 = arith.select %246, %244, %250 : vector<1x128xi1>, vector<1x128xf32>
    %252 = arith.addf %242, %251 : vector<1x128xf32>
    %c64_i32_99 = arith.constant 64 : i32
    %253 = tpu.dynamic_rotate %249 by %c64_i32_99 dim 1 : vector<1x128xf32>, i32 -> vector<1x128xf32>
    %c64_i32_100 = arith.constant 64 : i32
    %254 = tpu.dynamic_rotate %252 by %c64_i32_100 dim 1 : vector<1x128xf32>, i32 -> vector<1x128xf32>
    %c64_i32_101 = arith.constant 64 : i32
    %255 = vector.broadcast %c64_i32_101 : i32 to vector<1x128xi32>
    %256 = arith.cmpi sge, %192, %255 : vector<1x128xi32>
    %cst_102 = arith.constant 0.000000e+00 : f32
    %257 = vector.broadcast %cst_102 : f32 to vector<1x128xf32>
    %258 = arith.select %256, %253, %257 : vector<1x128xi1>, vector<1x128xf32>
    %259 = arith.addf %249, %258 : vector<1x128xf32>
    %cst_103 = arith.constant 0.000000e+00 : f32
    %260 = vector.broadcast %cst_103 : f32 to vector<1x128xf32>
    %261 = arith.select %256, %254, %260 : vector<1x128xi1>, vector<1x128xf32>
    %262 = arith.addf %252, %261 : vector<1x128xf32>
    %263 = arith.mulf %259, %10 : vector<1x128xf32>
    %264 = arith.mulf %262, %10 : vector<1x128xf32>
    %265 = arith.mulf %263, %263 : vector<1x128xf32>
    %266 = arith.subf %264, %265 : vector<1x128xf32>
    %cst_104 = arith.constant 0.000000e+00 : f32
    %267 = vector.broadcast %cst_104 : f32 to vector<1x128xf32>
    %268 = arith.maximumf %266, %267 : vector<1x128xf32>
    %cst_105 = arith.constant 9.99999993E-9 : f32
    %269 = vector.broadcast %cst_105 : f32 to vector<1x128xf32>
    %270 = arith.addf %268, %269 : vector<1x128xf32>
    %271 = math.rsqrt %270 : vector<1x128xf32>
    %272 = vector.broadcast %263 : vector<1x128xf32> to vector<32x128xf32>
    %273 = arith.subf %184, %272 : vector<32x128xf32>
    %274 = vector.broadcast %271 : vector<1x128xf32> to vector<32x128xf32>
    %275 = arith.mulf %273, %274 : vector<32x128xf32>
    %276 = vector.broadcast %185 : vector<32x1xf32> to vector<32x128xf32>
    %277 = arith.mulf %275, %276 : vector<32x128xf32>
    %278 = vector.broadcast %186 : vector<32x1xf32> to vector<32x128xf32>
    %279 = arith.addf %277, %278 : vector<32x128xf32>
    %c0_106 = arith.constant 0 : index
    %c0_107 = arith.constant 0 : index
    %280 = vector.load %arg12[%c0_106, %c0_107] : memref<6x32xf32, #tpu.memory_space<vmem>>, vector<6x32xf32>
    %c0_108 = arith.constant 0 : index
    %c0_109 = arith.constant 0 : index
    %281 = vector.load %arg13[%c0_108, %c0_109] : memref<6x1xf32, #tpu.memory_space<vmem>>, vector<6x1xf32>
    %282 = vector.extract_strided_slice %280 {offsets = [0, 0], sizes = [6, 1], strides = [1, 1]} : vector<6x32xf32> to vector<6x1xf32>
    %283 = vector.extract_strided_slice %279 {offsets = [0, 0], sizes = [1, 128], strides = [1, 1]} : vector<32x128xf32> to vector<1x128xf32>
    %284 = vector.broadcast %282 : vector<6x1xf32> to vector<6x128xf32>
    %285 = vector.broadcast %283 : vector<1x128xf32> to vector<6x128xf32>
    %286 = arith.mulf %284, %285 : vector<6x128xf32>
    %287 = vector.broadcast %281 : vector<6x1xf32> to vector<6x128xf32>
    %288 = arith.addf %287, %286 : vector<6x128xf32>
    %289 = vector.extract_strided_slice %280 {offsets = [0, 1], sizes = [6, 1], strides = [1, 1]} : vector<6x32xf32> to vector<6x1xf32>
    %290 = vector.extract_strided_slice %279 {offsets = [1, 0], sizes = [1, 128], strides = [1, 1]} : vector<32x128xf32> to vector<1x128xf32>
    %291 = vector.broadcast %289 : vector<6x1xf32> to vector<6x128xf32>
    %292 = vector.broadcast %290 : vector<1x128xf32> to vector<6x128xf32>
    %293 = arith.mulf %291, %292 : vector<6x128xf32>
    %294 = arith.addf %288, %293 : vector<6x128xf32>
    %295 = vector.extract_strided_slice %280 {offsets = [0, 2], sizes = [6, 1], strides = [1, 1]} : vector<6x32xf32> to vector<6x1xf32>
    %296 = vector.extract_strided_slice %279 {offsets = [2, 0], sizes = [1, 128], strides = [1, 1]} : vector<32x128xf32> to vector<1x128xf32>
    %297 = vector.broadcast %295 : vector<6x1xf32> to vector<6x128xf32>
    %298 = vector.broadcast %296 : vector<1x128xf32> to vector<6x128xf32>
    %299 = arith.mulf %297, %298 : vector<6x128xf32>
    %300 = arith.addf %294, %299 : vector<6x128xf32>
    %301 = vector.extract_strided_slice %280 {offsets = [0, 3], sizes = [6, 1], strides = [1, 1]} : vector<6x32xf32> to vector<6x1xf32>
    %302 = vector.extract_strided_slice %279 {offsets = [3, 0], sizes = [1, 128], strides = [1, 1]} : vector<32x128xf32> to vector<1x128xf32>
    %303 = vector.broadcast %301 : vector<6x1xf32> to vector<6x128xf32>
    %304 = vector.broadcast %302 : vector<1x128xf32> to vector<6x128xf32>
    %305 = arith.mulf %303, %304 : vector<6x128xf32>
    %306 = arith.addf %300, %305 : vector<6x128xf32>
    %307 = vector.extract_strided_slice %280 {offsets = [0, 4], sizes = [6, 1], strides = [1, 1]} : vector<6x32xf32> to vector<6x1xf32>
    %308 = vector.extract_strided_slice %279 {offsets = [4, 0], sizes = [1, 128], strides = [1, 1]} : vector<32x128xf32> to vector<1x128xf32>
    %309 = vector.broadcast %307 : vector<6x1xf32> to vector<6x128xf32>
    %310 = vector.broadcast %308 : vector<1x128xf32> to vector<6x128xf32>
    %311 = arith.mulf %309, %310 : vector<6x128xf32>
    %312 = arith.addf %306, %311 : vector<6x128xf32>
    %313 = vector.extract_strided_slice %280 {offsets = [0, 5], sizes = [6, 1], strides = [1, 1]} : vector<6x32xf32> to vector<6x1xf32>
    %314 = vector.extract_strided_slice %279 {offsets = [5, 0], sizes = [1, 128], strides = [1, 1]} : vector<32x128xf32> to vector<1x128xf32>
    %315 = vector.broadcast %313 : vector<6x1xf32> to vector<6x128xf32>
    %316 = vector.broadcast %314 : vector<1x128xf32> to vector<6x128xf32>
    %317 = arith.mulf %315, %316 : vector<6x128xf32>
    %318 = arith.addf %312, %317 : vector<6x128xf32>
    %319 = vector.extract_strided_slice %280 {offsets = [0, 6], sizes = [6, 1], strides = [1, 1]} : vector<6x32xf32> to vector<6x1xf32>
    %320 = vector.extract_strided_slice %279 {offsets = [6, 0], sizes = [1, 128], strides = [1, 1]} : vector<32x128xf32> to vector<1x128xf32>
    %321 = vector.broadcast %319 : vector<6x1xf32> to vector<6x128xf32>
    %322 = vector.broadcast %320 : vector<1x128xf32> to vector<6x128xf32>
    %323 = arith.mulf %321, %322 : vector<6x128xf32>
    %324 = arith.addf %318, %323 : vector<6x128xf32>
    %325 = vector.extract_strided_slice %280 {offsets = [0, 7], sizes = [6, 1], strides = [1, 1]} : vector<6x32xf32> to vector<6x1xf32>
    %326 = vector.extract_strided_slice %279 {offsets = [7, 0], sizes = [1, 128], strides = [1, 1]} : vector<32x128xf32> to vector<1x128xf32>
    %327 = vector.broadcast %325 : vector<6x1xf32> to vector<6x128xf32>
    %328 = vector.broadcast %326 : vector<1x128xf32> to vector<6x128xf32>
    %329 = arith.mulf %327, %328 : vector<6x128xf32>
    %330 = arith.addf %324, %329 : vector<6x128xf32>
    %331 = vector.extract_strided_slice %280 {offsets = [0, 8], sizes = [6, 1], strides = [1, 1]} : vector<6x32xf32> to vector<6x1xf32>
    %332 = vector.extract_strided_slice %279 {offsets = [8, 0], sizes = [1, 128], strides = [1, 1]} : vector<32x128xf32> to vector<1x128xf32>
    %333 = vector.broadcast %331 : vector<6x1xf32> to vector<6x128xf32>
    %334 = vector.broadcast %332 : vector<1x128xf32> to vector<6x128xf32>
    %335 = arith.mulf %333, %334 : vector<6x128xf32>
    %336 = arith.addf %330, %335 : vector<6x128xf32>
    %337 = vector.extract_strided_slice %280 {offsets = [0, 9], sizes = [6, 1], strides = [1, 1]} : vector<6x32xf32> to vector<6x1xf32>
    %338 = vector.extract_strided_slice %279 {offsets = [9, 0], sizes = [1, 128], strides = [1, 1]} : vector<32x128xf32> to vector<1x128xf32>
    %339 = vector.broadcast %337 : vector<6x1xf32> to vector<6x128xf32>
    %340 = vector.broadcast %338 : vector<1x128xf32> to vector<6x128xf32>
    %341 = arith.mulf %339, %340 : vector<6x128xf32>
    %342 = arith.addf %336, %341 : vector<6x128xf32>
    %343 = vector.extract_strided_slice %280 {offsets = [0, 10], sizes = [6, 1], strides = [1, 1]} : vector<6x32xf32> to vector<6x1xf32>
    %344 = vector.extract_strided_slice %279 {offsets = [10, 0], sizes = [1, 128], strides = [1, 1]} : vector<32x128xf32> to vector<1x128xf32>
    %345 = vector.broadcast %343 : vector<6x1xf32> to vector<6x128xf32>
    %346 = vector.broadcast %344 : vector<1x128xf32> to vector<6x128xf32>
    %347 = arith.mulf %345, %346 : vector<6x128xf32>
    %348 = arith.addf %342, %347 : vector<6x128xf32>
    %349 = vector.extract_strided_slice %280 {offsets = [0, 11], sizes = [6, 1], strides = [1, 1]} : vector<6x32xf32> to vector<6x1xf32>
    %350 = vector.extract_strided_slice %279 {offsets = [11, 0], sizes = [1, 128], strides = [1, 1]} : vector<32x128xf32> to vector<1x128xf32>
    %351 = vector.broadcast %349 : vector<6x1xf32> to vector<6x128xf32>
    %352 = vector.broadcast %350 : vector<1x128xf32> to vector<6x128xf32>
    %353 = arith.mulf %351, %352 : vector<6x128xf32>
    %354 = arith.addf %348, %353 : vector<6x128xf32>
    %355 = vector.extract_strided_slice %280 {offsets = [0, 12], sizes = [6, 1], strides = [1, 1]} : vector<6x32xf32> to vector<6x1xf32>
    %356 = vector.extract_strided_slice %279 {offsets = [12, 0], sizes = [1, 128], strides = [1, 1]} : vector<32x128xf32> to vector<1x128xf32>
    %357 = vector.broadcast %355 : vector<6x1xf32> to vector<6x128xf32>
    %358 = vector.broadcast %356 : vector<1x128xf32> to vector<6x128xf32>
    %359 = arith.mulf %357, %358 : vector<6x128xf32>
    %360 = arith.addf %354, %359 : vector<6x128xf32>
    %361 = vector.extract_strided_slice %280 {offsets = [0, 13], sizes = [6, 1], strides = [1, 1]} : vector<6x32xf32> to vector<6x1xf32>
    %362 = vector.extract_strided_slice %279 {offsets = [13, 0], sizes = [1, 128], strides = [1, 1]} : vector<32x128xf32> to vector<1x128xf32>
    %363 = vector.broadcast %361 : vector<6x1xf32> to vector<6x128xf32>
    %364 = vector.broadcast %362 : vector<1x128xf32> to vector<6x128xf32>
    %365 = arith.mulf %363, %364 : vector<6x128xf32>
    %366 = arith.addf %360, %365 : vector<6x128xf32>
    %367 = vector.extract_strided_slice %280 {offsets = [0, 14], sizes = [6, 1], strides = [1, 1]} : vector<6x32xf32> to vector<6x1xf32>
    %368 = vector.extract_strided_slice %279 {offsets = [14, 0], sizes = [1, 128], strides = [1, 1]} : vector<32x128xf32> to vector<1x128xf32>
    %369 = vector.broadcast %367 : vector<6x1xf32> to vector<6x128xf32>
    %370 = vector.broadcast %368 : vector<1x128xf32> to vector<6x128xf32>
    %371 = arith.mulf %369, %370 : vector<6x128xf32>
    %372 = arith.addf %366, %371 : vector<6x128xf32>
    %373 = vector.extract_strided_slice %280 {offsets = [0, 15], sizes = [6, 1], strides = [1, 1]} : vector<6x32xf32> to vector<6x1xf32>
    %374 = vector.extract_strided_slice %279 {offsets = [15, 0], sizes = [1, 128], strides = [1, 1]} : vector<32x128xf32> to vector<1x128xf32>
    %375 = vector.broadcast %373 : vector<6x1xf32> to vector<6x128xf32>
    %376 = vector.broadcast %374 : vector<1x128xf32> to vector<6x128xf32>
    %377 = arith.mulf %375, %376 : vector<6x128xf32>
    %378 = arith.addf %372, %377 : vector<6x128xf32>
    %379 = vector.extract_strided_slice %280 {offsets = [0, 16], sizes = [6, 1], strides = [1, 1]} : vector<6x32xf32> to vector<6x1xf32>
    %380 = vector.extract_strided_slice %279 {offsets = [16, 0], sizes = [1, 128], strides = [1, 1]} : vector<32x128xf32> to vector<1x128xf32>
    %381 = vector.broadcast %379 : vector<6x1xf32> to vector<6x128xf32>
    %382 = vector.broadcast %380 : vector<1x128xf32> to vector<6x128xf32>
    %383 = arith.mulf %381, %382 : vector<6x128xf32>
    %384 = arith.addf %378, %383 : vector<6x128xf32>
    %385 = vector.extract_strided_slice %280 {offsets = [0, 17], sizes = [6, 1], strides = [1, 1]} : vector<6x32xf32> to vector<6x1xf32>
    %386 = vector.extract_strided_slice %279 {offsets = [17, 0], sizes = [1, 128], strides = [1, 1]} : vector<32x128xf32> to vector<1x128xf32>
    %387 = vector.broadcast %385 : vector<6x1xf32> to vector<6x128xf32>
    %388 = vector.broadcast %386 : vector<1x128xf32> to vector<6x128xf32>
    %389 = arith.mulf %387, %388 : vector<6x128xf32>
    %390 = arith.addf %384, %389 : vector<6x128xf32>
    %391 = vector.extract_strided_slice %280 {offsets = [0, 18], sizes = [6, 1], strides = [1, 1]} : vector<6x32xf32> to vector<6x1xf32>
    %392 = vector.extract_strided_slice %279 {offsets = [18, 0], sizes = [1, 128], strides = [1, 1]} : vector<32x128xf32> to vector<1x128xf32>
    %393 = vector.broadcast %391 : vector<6x1xf32> to vector<6x128xf32>
    %394 = vector.broadcast %392 : vector<1x128xf32> to vector<6x128xf32>
    %395 = arith.mulf %393, %394 : vector<6x128xf32>
    %396 = arith.addf %390, %395 : vector<6x128xf32>
    %397 = vector.extract_strided_slice %280 {offsets = [0, 19], sizes = [6, 1], strides = [1, 1]} : vector<6x32xf32> to vector<6x1xf32>
    %398 = vector.extract_strided_slice %279 {offsets = [19, 0], sizes = [1, 128], strides = [1, 1]} : vector<32x128xf32> to vector<1x128xf32>
    %399 = vector.broadcast %397 : vector<6x1xf32> to vector<6x128xf32>
    %400 = vector.broadcast %398 : vector<1x128xf32> to vector<6x128xf32>
    %401 = arith.mulf %399, %400 : vector<6x128xf32>
    %402 = arith.addf %396, %401 : vector<6x128xf32>
    %403 = vector.extract_strided_slice %280 {offsets = [0, 20], sizes = [6, 1], strides = [1, 1]} : vector<6x32xf32> to vector<6x1xf32>
    %404 = vector.extract_strided_slice %279 {offsets = [20, 0], sizes = [1, 128], strides = [1, 1]} : vector<32x128xf32> to vector<1x128xf32>
    %405 = vector.broadcast %403 : vector<6x1xf32> to vector<6x128xf32>
    %406 = vector.broadcast %404 : vector<1x128xf32> to vector<6x128xf32>
    %407 = arith.mulf %405, %406 : vector<6x128xf32>
    %408 = arith.addf %402, %407 : vector<6x128xf32>
    %409 = vector.extract_strided_slice %280 {offsets = [0, 21], sizes = [6, 1], strides = [1, 1]} : vector<6x32xf32> to vector<6x1xf32>
    %410 = vector.extract_strided_slice %279 {offsets = [21, 0], sizes = [1, 128], strides = [1, 1]} : vector<32x128xf32> to vector<1x128xf32>
    %411 = vector.broadcast %409 : vector<6x1xf32> to vector<6x128xf32>
    %412 = vector.broadcast %410 : vector<1x128xf32> to vector<6x128xf32>
    %413 = arith.mulf %411, %412 : vector<6x128xf32>
    %414 = arith.addf %408, %413 : vector<6x128xf32>
    %415 = vector.extract_strided_slice %280 {offsets = [0, 22], sizes = [6, 1], strides = [1, 1]} : vector<6x32xf32> to vector<6x1xf32>
    %416 = vector.extract_strided_slice %279 {offsets = [22, 0], sizes = [1, 128], strides = [1, 1]} : vector<32x128xf32> to vector<1x128xf32>
    %417 = vector.broadcast %415 : vector<6x1xf32> to vector<6x128xf32>
    %418 = vector.broadcast %416 : vector<1x128xf32> to vector<6x128xf32>
    %419 = arith.mulf %417, %418 : vector<6x128xf32>
    %420 = arith.addf %414, %419 : vector<6x128xf32>
    %421 = vector.extract_strided_slice %280 {offsets = [0, 23], sizes = [6, 1], strides = [1, 1]} : vector<6x32xf32> to vector<6x1xf32>
    %422 = vector.extract_strided_slice %279 {offsets = [23, 0], sizes = [1, 128], strides = [1, 1]} : vector<32x128xf32> to vector<1x128xf32>
    %423 = vector.broadcast %421 : vector<6x1xf32> to vector<6x128xf32>
    %424 = vector.broadcast %422 : vector<1x128xf32> to vector<6x128xf32>
    %425 = arith.mulf %423, %424 : vector<6x128xf32>
    %426 = arith.addf %420, %425 : vector<6x128xf32>
    %427 = vector.extract_strided_slice %280 {offsets = [0, 24], sizes = [6, 1], strides = [1, 1]} : vector<6x32xf32> to vector<6x1xf32>
    %428 = vector.extract_strided_slice %279 {offsets = [24, 0], sizes = [1, 128], strides = [1, 1]} : vector<32x128xf32> to vector<1x128xf32>
    %429 = vector.broadcast %427 : vector<6x1xf32> to vector<6x128xf32>
    %430 = vector.broadcast %428 : vector<1x128xf32> to vector<6x128xf32>
    %431 = arith.mulf %429, %430 : vector<6x128xf32>
    %432 = arith.addf %426, %431 : vector<6x128xf32>
    %433 = vector.extract_strided_slice %280 {offsets = [0, 25], sizes = [6, 1], strides = [1, 1]} : vector<6x32xf32> to vector<6x1xf32>
    %434 = vector.extract_strided_slice %279 {offsets = [25, 0], sizes = [1, 128], strides = [1, 1]} : vector<32x128xf32> to vector<1x128xf32>
    %435 = vector.broadcast %433 : vector<6x1xf32> to vector<6x128xf32>
    %436 = vector.broadcast %434 : vector<1x128xf32> to vector<6x128xf32>
    %437 = arith.mulf %435, %436 : vector<6x128xf32>
    %438 = arith.addf %432, %437 : vector<6x128xf32>
    %439 = vector.extract_strided_slice %280 {offsets = [0, 26], sizes = [6, 1], strides = [1, 1]} : vector<6x32xf32> to vector<6x1xf32>
    %440 = vector.extract_strided_slice %279 {offsets = [26, 0], sizes = [1, 128], strides = [1, 1]} : vector<32x128xf32> to vector<1x128xf32>
    %441 = vector.broadcast %439 : vector<6x1xf32> to vector<6x128xf32>
    %442 = vector.broadcast %440 : vector<1x128xf32> to vector<6x128xf32>
    %443 = arith.mulf %441, %442 : vector<6x128xf32>
    %444 = arith.addf %438, %443 : vector<6x128xf32>
    %445 = vector.extract_strided_slice %280 {offsets = [0, 27], sizes = [6, 1], strides = [1, 1]} : vector<6x32xf32> to vector<6x1xf32>
    %446 = vector.extract_strided_slice %279 {offsets = [27, 0], sizes = [1, 128], strides = [1, 1]} : vector<32x128xf32> to vector<1x128xf32>
    %447 = vector.broadcast %445 : vector<6x1xf32> to vector<6x128xf32>
    %448 = vector.broadcast %446 : vector<1x128xf32> to vector<6x128xf32>
    %449 = arith.mulf %447, %448 : vector<6x128xf32>
    %450 = arith.addf %444, %449 : vector<6x128xf32>
    %451 = vector.extract_strided_slice %280 {offsets = [0, 28], sizes = [6, 1], strides = [1, 1]} : vector<6x32xf32> to vector<6x1xf32>
    %452 = vector.extract_strided_slice %279 {offsets = [28, 0], sizes = [1, 128], strides = [1, 1]} : vector<32x128xf32> to vector<1x128xf32>
    %453 = vector.broadcast %451 : vector<6x1xf32> to vector<6x128xf32>
    %454 = vector.broadcast %452 : vector<1x128xf32> to vector<6x128xf32>
    %455 = arith.mulf %453, %454 : vector<6x128xf32>
    %456 = arith.addf %450, %455 : vector<6x128xf32>
    %457 = vector.extract_strided_slice %280 {offsets = [0, 29], sizes = [6, 1], strides = [1, 1]} : vector<6x32xf32> to vector<6x1xf32>
    %458 = vector.extract_strided_slice %279 {offsets = [29, 0], sizes = [1, 128], strides = [1, 1]} : vector<32x128xf32> to vector<1x128xf32>
    %459 = vector.broadcast %457 : vector<6x1xf32> to vector<6x128xf32>
    %460 = vector.broadcast %458 : vector<1x128xf32> to vector<6x128xf32>
    %461 = arith.mulf %459, %460 : vector<6x128xf32>
    %462 = arith.addf %456, %461 : vector<6x128xf32>
    %463 = vector.extract_strided_slice %280 {offsets = [0, 30], sizes = [6, 1], strides = [1, 1]} : vector<6x32xf32> to vector<6x1xf32>
    %464 = vector.extract_strided_slice %279 {offsets = [30, 0], sizes = [1, 128], strides = [1, 1]} : vector<32x128xf32> to vector<1x128xf32>
    %465 = vector.broadcast %463 : vector<6x1xf32> to vector<6x128xf32>
    %466 = vector.broadcast %464 : vector<1x128xf32> to vector<6x128xf32>
    %467 = arith.mulf %465, %466 : vector<6x128xf32>
    %468 = arith.addf %462, %467 : vector<6x128xf32>
    %469 = vector.extract_strided_slice %280 {offsets = [0, 31], sizes = [6, 1], strides = [1, 1]} : vector<6x32xf32> to vector<6x1xf32>
    %470 = vector.extract_strided_slice %279 {offsets = [31, 0], sizes = [1, 128], strides = [1, 1]} : vector<32x128xf32> to vector<1x128xf32>
    %471 = vector.broadcast %469 : vector<6x1xf32> to vector<6x128xf32>
    %472 = vector.broadcast %470 : vector<1x128xf32> to vector<6x128xf32>
    %473 = arith.mulf %471, %472 : vector<6x128xf32>
    %474 = arith.addf %468, %473 : vector<6x128xf32>
    %c0_110 = arith.constant 0 : index
    %c0_111 = arith.constant 0 : index
    %c0_112 = arith.constant 0 : index
    %475 = vector.load %arg14[%c0_110, %c0_111, %c0_112] : memref<1x6x128xf32, #tpu.memory_space<vmem>>, vector<1x6x128xf32>
    %476 = vector.shape_cast %475 : vector<1x6x128xf32> to vector<6x128xf32>
    %477 = vector.shape_cast %474 : vector<6x128xf32> to vector<1x6x128xf32>
    tpu.vector_store %arg14[%c0_110, %c0_111, %c0_112], %477 {strides = array<i32>} : memref<1x6x128xf32, #tpu.memory_space<vmem>>, vector<1x6x128xf32>,
    return
  }
  func.func @transform_0(%arg0: i32) -> (i32, i32, i32) {
    %c0_i32 = arith.constant 0 : i32
    %c0_i32_0 = arith.constant 0 : i32
    %c0_i32_1 = arith.constant 0 : i32
    return %arg0, %c0_i32, %c0_i32_0 : i32, i32, i32
  }
  func.func @transform_1(%arg0: i32) -> (i32, i32) {
    %c0_i32 = arith.constant 0 : i32
    %c0_i32_0 = arith.constant 0 : i32
    %c0_i32_1 = arith.constant 0 : i32
    return %c0_i32, %c0_i32_0 : i32, i32
  }
  func.func @transform_2(%arg0: i32) -> (i32, i32) {
    %c0_i32 = arith.constant 0 : i32
    %c0_i32_0 = arith.constant 0 : i32
    %c0_i32_1 = arith.constant 0 : i32
    return %c0_i32, %c0_i32_0 : i32, i32
  }
  func.func @transform_3(%arg0: i32) -> i32 {
    %c0_i32 = arith.constant 0 : i32
    %c0_i32_0 = arith.constant 0 : i32
    return %c0_i32 : i32
  }
  func.func @transform_4(%arg0: i32) -> (i32, i32) {
    %c0_i32 = arith.constant 0 : i32
    %c0_i32_0 = arith.constant 0 : i32
    %c0_i32_1 = arith.constant 0 : i32
    return %c0_i32, %c0_i32_0 : i32, i32
  }
  func.func @transform_5(%arg0: i32) -> (i32, i32) {
    %c0_i32 = arith.constant 0 : i32
    %c0_i32_0 = arith.constant 0 : i32
    %c0_i32_1 = arith.constant 0 : i32
    return %c0_i32, %c0_i32_0 : i32, i32
  }
  func.func @transform_6(%arg0: i32) -> (i32, i32, i32) {
    %c0_i32 = arith.constant 0 : i32
    %c0_i32_0 = arith.constant 0 : i32
    %c0_i32_1 = arith.constant 0 : i32
    %c0_i32_2 = arith.constant 0 : i32
    return %c0_i32, %c0_i32_0, %c0_i32_1 : i32, i32, i32
  }
  func.func @transform_7(%arg0: i32) -> (i32, i32) {
    %c0_i32 = arith.constant 0 : i32
    %c0_i32_0 = arith.constant 0 : i32
    %c0_i32_1 = arith.constant 0 : i32
    return %c0_i32, %c0_i32_0 : i32, i32
  }
  func.func @transform_8(%arg0: i32) -> i32 {
    %c0_i32 = arith.constant 0 : i32
    %c0_i32_0 = arith.constant 0 : i32
    return %c0_i32 : i32
  }
  func.func @transform_9(%arg0: i32) -> (i32, i32) {
    %c0_i32 = arith.constant 0 : i32
    %c0_i32_0 = arith.constant 0 : i32
    %c0_i32_1 = arith.constant 0 : i32
    return %c0_i32, %c0_i32_0 : i32, i32
  }
  func.func @transform_10(%arg0: i32) -> (i32, i32) {
    %c0_i32 = arith.constant 0 : i32
    %c0_i32_0 = arith.constant 0 : i32
    %c0_i32_1 = arith.constant 0 : i32
    return %c0_i32, %c0_i32_0 : i32, i32
  }
  func.func @transform_11(%arg0: i32) -> (i32, i32) {
    %c0_i32 = arith.constant 0 : i32
    %c0_i32_0 = arith.constant 0 : i32
    %c0_i32_1 = arith.constant 0 : i32
    return %c0_i32, %c0_i32_0 : i32, i32
  }
  func.func @transform_12(%arg0: i32) -> (i32, i32) {
    %c0_i32 = arith.constant 0 : i32
    %c0_i32_0 = arith.constant 0 : i32
    %c0_i32_1 = arith.constant 0 : i32
    return %c0_i32, %c0_i32_0 : i32, i32
  }
  func.func @transform_13(%arg0: i32) -> (i32, i32, i32) {
    %c0_i32 = arith.constant 0 : i32
    %c0_i32_0 = arith.constant 0 : i32
    %c0_i32_1 = arith.constant 0 : i32
    return %arg0, %c0_i32, %c0_i32_0 : i32, i32, i32
  }
}

</mosaic_0001>

<bundles_post_ra>
// kernel: tpu_custom_call.1
= control target key start
LH: loop header
LB: loop body
LE: loop exit
PB: predicated region body
PF: predicated region fallthrough
CT: control target
= control target key end

     0   :  { %s1720_s29 = smov 0   ;;  %s2203_s0 = inlined_call_operand.vmem [shape: f32[2,4,128], index: 0, kind: input, shape index: {}]   ;;  %s2204_s1 = inlined_call_operand.vmem [shape: f32[32,4], index: 1, kind: input, shape index: {}]   ;;  %s2205_s2 = inlined_call_operand.vmem [shape: f32[32,1], index: 2, kind: input, shape index: {}]   ;;  %s2206_s3 = inlined_call_operand.<no memory space> [shape: f32[1], index: 3, kind: input, shape index: {}]   ;;  %s2207_s4 = inlined_call_operand.vmem [shape: f32[32,1], index: 4, kind: input, shape index: {}]   ;;  %s2208_s5 = inlined_call_operand.vmem [shape: f32[32,1], index: 5, kind: input, shape index: {}]   ;;  %s2209_s6 = inlined_call_operand.vmem [shape: f32[3,32,1], index: 6, kind: input, shape index: {}]   ;;  %s2210_s7 = inlined_call_operand.vmem [shape: f32[32,1], index: 7, kind: input, shape index: {}]   ;;  %s2211_s8 = inlined_call_operand.<no memory space> [shape: f32[1], index: 8, kind: input, shape index: {}]   ;;  %s2212_s9 = inlined_call_operand.vmem [shape: f32[32,1], index: 9, kind: input, shape index: {}]   ;;  %s2213_s10 = inlined_call_operand.vmem [shape: f32[32,1], index: 10, kind: input, shape index: {}]   ;;  %s2214_s11 = inlined_call_operand.vmem [shape: f32[6,32], index: 11, kind: input, shape index: {}]   ;;  %s2215_s12 = inlined_call_operand.vmem [shape: f32[6,1], index: 12, kind: input, shape index: {}]   ;;  %s2216_s13 = inlined_call_operand.vmem [shape: f32[2,6,128], index: 13, kind: output, shape index: {}]  }
   0x1   :  { %18 = sst [smem:[#allocation2]] %s2206_s3 }
   0x2   :  { %19 = sst [smem:[#allocation3]] %s2211_s8 }
   0x3 LB: > { %s1479_s30 = sadd.s32 4294967295, %s1602_s29   ;;  %p1483_p0 = scmp.ge.s32.totalorder %s1602_s29, 1  ;;  %s1602_s29 = sphi %s1720_s29, %s25_s29  }
   0x4   : > { %p388_p1 = scmp.lt.s32.totalorder %s1602_s29, 3 }
   0x6   : > { %p389_p2 = pnand %p1483_p0, %p388_p1 }
   0x7   : > { %p430_p3 = scmp.lt.s32.totalorder (!%p389_p2), %s1479_s30, 1  ;;  %s590_s15 = sld [smem:[#allocation2]] (!%p389_p2) }
   0x8   : > { %392 = sbr.rel (%p389_p2) target bundleno = 2176 (0x880), region = 72  ;;  %s1608_s16 = smov (!%p389_p2), 1  }
   0x9   : > { %s1609_s17 = smov (!%p389_p2), 2   ;;  %s1610_s18 = smov (!%p389_p2), 4  }
   0xa   : > { %s1611_s19 = smov (!%p389_p2), 8   ;;  %s1612_s20 = smov (!%p389_p2), 16  }
   0xb   : > { %s1613_s21 = smov (!%p389_p2), 32   ;;  %s1614_s22 = smov (!%p389_p2), 64  }
   0xd   : > { %v448_v0 = vld [vmem:[%s2204_s1 + $0x10] sm:$0xff]  ;;  %v446_v1 = vld [vmem:[%s2204_s1] sm:$0xff]  ;;  %v1604_v2 = vmov 0   ;;  %v447_v4 = vld [vmem:[%s2204_s1 + $0x8] sm:$0xff]  ;;  %v1605_v6 = vmov 1   ;;  %v1606_v9 = vmov 2   ;;  %v439_v20 = vlaneseq }
   0xe   : > { %1545 = vset.pattern.permute.xlu1 %v1604_v2  ;;  %1544 = vset.pattern.permute.xlu0 %v1604_v2  ;;  %v450_v3 = vld [vmem:[%s2205_s2] sm:$0xff]  ;;  %v451_v5 = vld [vmem:[%s2205_s2 + $0x8] sm:$0xff]  ;;  %v449_v7 = vld [vmem:[%s2204_s1 + $0x18] sm:$0xff]  ;;  %v1607_v11 = vmov 3   ;;  %s2218_s30 = smov (!%p430_p3, %s1479_s30), 1 }
   0xf   : > { %466 = vperm.xlu1 %1545, %v448_v0   ;;  %456 = vperm.xlu0 %1544, %v446_v1   ;;  %v452_v8 = vld [vmem:[%s2205_s2 + $0x10] sm:$0xff]  ;;  %v453_v10 = vld [vmem:[%s2205_s2 + $0x18] sm:$0xff]  ;;  %s1484_s28 = sshll.u32 %s2218_s30, 2  ;;  %v1769_v23 = vshrl.u32 %v439_v20, 7 }
  0x10   : > { %s433_s8 = scalar_lea.vmem %s2203_s0, %s1484_s28 }
  0x11   : > { %v1775_v26 = vsub.s32 0, %v1769_v23  ;;  %v1778_v27 = vsub.s32 1, %v1769_v23  ;;  %v438_v28 = vld [vmem:[%s433_s8] sm:$0xf]  ;;  %v1781_v29 = vsub.s32 2, %v1769_v23  ;;  %v1786_v34 = vsub.s32 3, %v1769_v23 }
  0x12   : > { %s1615_s8 = smov 127  }
  0x13   : > { %484 = vperm.xlu1 %1545, %v450_v3   ;;  %461 = vperm.xlu0 %1544, %v447_v4   ;;  %v477_v31 = vrot.slane %v438_v28, %v1775_v26  ;;  %v525_v32 = vrot.slane %v438_v28, %v1778_v27  ;;  %v553_v37 = vrot.slane %v438_v28, %v1781_v29 }
  0x14   : > { %v581_v40 = vrot.slane %v438_v28, %v1786_v34 }
  0x17   : > { %1546 = vset.pattern.permute.xlu1 %v1605_v6  ;;  %489 = vperm.xlu0 %1544, %v451_v5  }
  0x18   : > { %507 = vperm.xlu1 %1546, %v446_v1  }
  0x1b   : > { %1547 = vset.pattern.permute.xlu0 %v1605_v6 }
  0x1c   : > { %1548 = vset.pattern.permute.xlu1 %v1604_v2  ;;  %511 = vperm.xlu0 %1547, %v447_v4  }
  0x1d   : > { %471 = vperm.xlu1 %1548, %v449_v7  }
  0x20   : > { %515 = vperm.xlu0 %1547, %v448_v0  }
  0x21   : > { %494 = vperm.xlu1 %1548, %v452_v8  }
  0x24   : > { %1550 = vset.pattern.permute.xlu0 %v1606_v9 }
  0x25   : > { %1549 = vset.pattern.permute.xlu1 %v1606_v9  ;;  %539 = vperm.xlu0 %1550, %v447_v4  }
  0x26   : > { %535 = vperm.xlu1 %1549, %v446_v1  }
  0x29   : > { %543 = vperm.xlu0 %1550, %v448_v0  }
  0x2a   : > { %1551 = vset.pattern.permute.xlu1 %v1604_v2 }
  0x2b   : > { %499 = vperm.xlu1 %1551, %v453_v10  }
  0x2d   : > { %1554 = vset.pattern.permute.xlu0 %v1607_v11 }
  0x2e   : > { %567 = vperm.xlu0 %1554, %v447_v4  }
  0x2f   : > { %1552 = vset.pattern.permute.xlu1 %v1605_v6 }
  0x30   : > { %519 = vperm.xlu1 %1552, %v449_v7  }
  0x32   : > { %575 = vperm.xlu0 %1554, %v449_v7  }
  0x34   : > { %1553 = vset.pattern.permute.xlu1 %v1607_v11 }
  0x35   : > { %563 = vperm.xlu1 %1553, %v446_v1  }
  0x36   : > { %1558 = vset.pattern.permute.xlu0 %v1604_v2 }
  0x39   : > { %1555 = vset.pattern.permute.xlu1 %v1606_v9 }
  0x3a   : > { %547 = vperm.xlu1 %1555, %v449_v7  }
  0x3e   : > { %1556 = vset.pattern.permute.xlu1 %v1607_v11 }
  0x3f   : > { %571 = vperm.xlu1 %1556, %v448_v0   ;;  %v595_v0 = vstv %s590_s15  ;;  %s926_s15 = sld [smem:[#allocation3]] }
  0x43   : > { %1557 = vset.pattern.permute.xlu1 %v1604_v2 }
  0x8a   : > { %v467_v12 = vpop.permute.xlu1 %466  ;;  %v457_v13 = vpop.permute.xlu0 %456 }
  0x8b   : > { %v478_v35 = vmul.f32 %v477_v31, %v457_v13  ;;  %v480_v55 = vmul.f32 %v477_v31, %v467_v12 }
  0x8e   : > { %v485_v14 = vpop.permute.xlu1 %484  ;;  %v462_v15 = vpop.permute.xlu0 %461 }
  0x8f   : > { %v479_v36 = vmul.f32 %v477_v31, %v462_v15  ;;  %v502_v41 = vadd.f32 %v485_v14, %v478_v35 }
  0x92   : > { %v490_v16 = vpop.permute.xlu0 %489 }
  0x93   : > { %v508_v17 = vpop.permute.xlu1 %507  ;;  %v503_v42 = vadd.f32 %v490_v16, %v479_v36 }
  0x94   : > { %v526_v38 = vmul.f32 %v525_v32, %v508_v17 }
  0x96   : > { %v530_v46 = vadd.f32 %v526_v38, %v502_v41 }
  0x97   : > { %v512_v18 = vpop.permute.xlu0 %511 }
  0x98   : > { %v472_v19 = vpop.permute.xlu1 %471  ;;  %v527_v43 = vmul.f32 %v525_v32, %v512_v18 }
  0x99   : > { %v481_v53 = vmul.f32 %v477_v31, %v472_v19 }
  0x9a   : > { %v531_v49 = vadd.f32 %v527_v43, %v503_v42 }
  0x9b   : > { %v516_v22 = vpop.permute.xlu0 %515 }
  0x9c   : > { %v495_v21 = vpop.permute.xlu1 %494  ;;  %v528_v61 = vmul.f32 %v525_v32, %v516_v22 }
  0x9d   : > { %v504_v60 = vadd.f32 %v495_v21, %v480_v55 }
  0x9f   : > { %v532_v8 = vadd.f32 %v528_v61, %v504_v60 }
  0xa0   : > { %v540_v25 = vpop.permute.xlu0 %539 }
  0xa1   : > { %v536_v24 = vpop.permute.xlu1 %535  ;;  %v555_v47 = vmul.f32 %v553_v37, %v540_v25 }
  0xa2   : > { %v554_v44 = vmul.f32 %v553_v37, %v536_v24 }
  0xa3   : > { %v559_v56 = vadd.f32 %v555_v47, %v531_v49 }
  0xa4   : > { %v544_v33 = vpop.permute.xlu0 %543  ;;  %v558_v50 = vadd.f32 %v554_v44, %v530_v46 }
  0xa5   : > { %v556_v4 = vmul.f32 %v553_v37, %v544_v33 }
  0xa6   : > { %v500_v30 = vpop.permute.xlu1 %499 }
  0xa7   : > { %v505_v59 = vadd.f32 %v500_v30, %v481_v53  ;;  %v560_v14 = vadd.f32 %v556_v4, %v532_v8 }
  0xa9   : > { %v568_v45 = vpop.permute.xlu0 %567 }
  0xaa   : > { %v583_v51 = vmul.f32 %v581_v40, %v568_v45 }
  0xab   : > { %v520_v39 = vpop.permute.xlu1 %519 }
  0xac   : > { %v529_v54 = vmul.f32 %v525_v32, %v520_v39  ;;  %v587_v62 = vadd.f32 %v583_v51, %v559_v56  ;;  %v1813_v51 = vand.u32 127, %v439_v20 }
  0xad   : > { %v576_v58 = vpop.permute.xlu0 %575 }
  0xae   : > { %v533_v1 = vadd.f32 %v529_v54, %v505_v59  ;;  %v585_v3 = vmul.f32 %v581_v40, %v576_v58  ;;  %v597_v10 = vmul.f32 %v595_v0, %v587_v62  ;;  %vm592_vm1 = vcmp.gt.f32.partialorder %v587_v62, 0.0 }
  0xaf   : > { %vm638_vm4 = vcmp.ge.s32.totalorder %v1813_v51, 1  ;;  %vm647_vm5 = vcmp.ge.s32.totalorder %v1813_v51, 2  ;;  %vm656_vm6 = vcmp.ge.s32.totalorder %v1813_v51, 4  ;;  %vm665_vm7 = vcmp.ge.s32.totalorder %v1813_v51, 8 }
  0xb0   : > { %v564_v48 = vpop.permute.xlu1 %563  ;;  %v1792_v17 = vsel %vm592_vm1, %v587_v62, %v597_v10  ;;  %vm674_vm8 = vcmp.ge.s32.totalorder %v1813_v51, 16  ;;  %vm683_vm9 = vcmp.ge.s32.totalorder %v1813_v51, 32  ;;  %vm692_vm10 = vcmp.ge.s32.totalorder %v1813_v51, 64 }
  0xb1   : > { %v582_v52 = vmul.f32 %v581_v40, %v564_v48  ;;  %v622_v24 = vmul.f32 %v1792_v17, %v1792_v17  ;;  %vm887_vm11 = vcmp.lt.s32.totalorder %v1813_v51, 127 }
  0xb3   : > { %v586_v57 = vadd.f32 %v582_v52, %v558_v50 }
  0xb5   : > { %v548_v63 = vpop.permute.xlu1 %547  ;;  %v596_v5 = vmul.f32 %v595_v0, %v586_v57  ;;  %vm591_vm0 = vcmp.gt.f32.partialorder %v586_v57, 0.0 }
  0xb6   : > { %v557_v2 = vmul.f32 %v553_v37, %v548_v63 }
  0xb7   : > { %v1790_v15 = vsel %vm591_vm0, %v586_v57, %v596_v5 }
  0xb8   : > { %v561_v7 = vadd.f32 %v557_v2, %v533_v1  ;;  %v621_v21 = vmul.f32 %v1790_v15, %v1790_v15  ;;  %v612_v25 = vadd.f32 %v1792_v17, %v1790_v15 }
  0xba   : > { %v589_v12 = vadd.f32 %v585_v3, %v561_v7  ;;  %v572_v13 = vpop.permute.xlu1 %571  ;;  %v625_v31 = vadd.f32 %v622_v24, %v621_v21 }
  0xbb   : > { %v584_v16 = vmul.f32 %v581_v40, %v572_v13 }
  0xbc   : > { %v599_v18 = vmul.f32 %v595_v0, %v589_v12  ;;  %vm594_vm2 = vcmp.gt.f32.partialorder %v589_v12, 0.0 }
  0xbd   : > { %v588_v19 = vadd.f32 %v584_v16, %v560_v14 }
  0xbe   : > { %v1800_v28 = vsel %vm594_vm2, %v589_v12, %v599_v18 }
  0xbf   : > { %vm593_vm3 = vcmp.gt.f32.partialorder %v588_v19, 0.0  ;;  %v598_v22 = vmul.f32 %v595_v0, %v588_v19  ;;  %v624_v35 = vmul.f32 %v1800_v28, %v1800_v28 }
  0xc1   : > { %v1802_v30 = vsel %vm593_vm3, %v588_v19, %v598_v22 }
  0xc2   : > { %v613_v32 = vadd.f32 %v612_v25, %v1802_v30  ;;  %v623_v33 = vmul.f32 %v1802_v30, %v1802_v30 }
  0xc4   : > { %v614_v36 = vadd.f32 %v613_v32, %v1800_v28  ;;  %v626_v37 = vadd.f32 %v625_v31, %v623_v33 }
  0xc6   : > { %v615_v38 = vrot.slane %v614_v36, 4  ;;  %v627_v39 = vadd.f32 %v626_v37, %v624_v35  ;;  %v605_v37 = vld [vmem:[%s2207_s4 + $0x8] sm:$0xff] }
  0xc8   : > { %v616_v40 = vadd.f32 %v615_v38, %v614_v36  ;;  %v628_v41 = vrot.slane %v627_v39, 4  ;;  %v604_v36 = vld [vmem:[%s2207_s4] sm:$0xff]  ;;  %v606_v38 = vld [vmem:[%s2207_s4 + $0x10] sm:$0xff] }
  0xca   : > { %v617_v42 = vrot.slane %v616_v40, 2  ;;  %v629_v43 = vadd.f32 %v628_v41, %v627_v39  ;;  %v609_v39 = vld [vmem:[%s2208_s5 + $0x8] sm:$0xff]  ;;  %v610_v41 = vld [vmem:[%s2208_s5 + $0x10] sm:$0xff] }
  0xcc   : > { %v618_v44 = vadd.f32 %v617_v42, %v616_v40  ;;  %v630_v45 = vrot.slane %v629_v43, 2  ;;  %v608_v40 = vld [vmem:[%s2208_s5] sm:$0xff]  ;;  %v607_v42 = vld [vmem:[%s2207_s4 + $0x18] sm:$0xff] }
  0xce   : > { %v619_v46 = vrot.slane %v618_v44, 1  ;;  %v631_v47 = vadd.f32 %v630_v45, %v629_v43  ;;  %v782_v43 = vld [vmem:[%s2209_s6] sm:$0xff]  ;;  %v784_v45 = vld [vmem:[%s2209_s6 + $0x10] sm:$0xff] }
  0xd0   : > { %v620_v48 = vadd.f32 %v619_v46, %v618_v44  ;;  %v632_v49 = vrot.slane %v631_v47, 1  ;;  %v611_v44 = vld [vmem:[%s2208_s5 + $0x18] sm:$0xff]  ;;  %v783_v46 = vld [vmem:[%s2209_s6 + $0x8] sm:$0xff] }
  0xd2   : > { %634 = vrot.lane.b32.xlu1 %v620_v48, %s1608_s16  ;;  %v633_v50 = vadd.f32 %v632_v49, %v631_v47  ;;  %v769_v47 = vld [vmem:[%s2210_s7 + $0x8] sm:$0xff] }
  0xd3   : > { %v1487_v49 = vld [vmem:[%s2209_s6 + $0x28] sm:$0xff] }
  0xd4   : > { %636 = vrot.lane.b32.xlu0 %v633_v50, %s1608_s16 }
 0x144   : > { %v635_v52 = vpop.permute.xlu1 %634 }
 0x145   : > { %v639_v53 = vsel %vm638_vm4, %v635_v52, 0.0  ;;  %v770_v52 = vld [vmem:[%s2210_s7 + $0x10] sm:$0xff] }
 0x146   : > { %v640_v54 = vadd.f32 %v639_v53, %v620_v48  ;;  %v637_v55 = vpop.permute.xlu0 %636  ;;  %v768_v48 = vld [vmem:[%s2210_s7] sm:$0xff]  ;;  %v785_v53 = vld [vmem:[%s2209_s6 + $0x18] sm:$0xff] }
 0x147   : > { %v641_v56 = vsel %vm638_vm4, %v637_v55, 0.0  ;;  %v1488_v55 = vld [vmem:[%s2209_s6 + $0x30] sm:$0xff] }
 0x148   : > { %v642_v57 = vadd.f32 %v641_v56, %v633_v50  ;;  %643 = vrot.lane.b32.xlu1 %v640_v54, %s1609_s17  ;;  %v1486_v50 = vld [vmem:[%s2209_s6 + $0x20] sm:$0xff]  ;;  %v1489_v56 = vld [vmem:[%s2209_s6 + $0x38] sm:$0xff] }
 0x14a   : > { %645 = vrot.lane.b32.xlu0 %v642_v57, %s1609_s17 }
 0x1ba   : > { %v644_v20 = vpop.permute.xlu1 %643 }
 0x1bb   : > { %v648_v58 = vsel %vm647_vm5, %v644_v20, 0.0  ;;  %v771_v20 = vld [vmem:[%s2210_s7 + $0x18] sm:$0xff] }
 0x1bc   : > { %v649_v59 = vadd.f32 %v648_v58, %v640_v54  ;;  %v646_v60 = vpop.permute.xlu0 %645  ;;  %v1490_v54 = vld [vmem:[%s2209_s6 + $0x40] sm:$0xff]  ;;  %v1492_v58 = vld [vmem:[%s2209_s6 + $0x50] sm:$0xff] }
 0x1bd   : > { %v650_v61 = vsel %vm647_vm5, %v646_v60, 0.0  ;;  %v441_v60 = vcvt.s32.f32 %v1813_v51 }
 0x1be   : > { %v651_v62 = vadd.f32 %v650_v61, %v642_v57  ;;  %652 = vrot.lane.b32.xlu1 %v649_v59, %s1610_s18  ;;  %v1491_v57 = vld [vmem:[%s2209_s6 + $0x48] sm:$0xff] }
 0x1bf   : > { %v442_v61 = vadd.f32 1.0, %v441_v60 }
 0x1c0   : > { %654 = vrot.lane.b32.xlu0 %v651_v62, %s1610_s18 }
 0x230   : > { %v653_v63 = vpop.permute.xlu1 %652 }
 0x231   : > { %v657_v0 = vsel %vm656_vm6, %v653_v63, 0.0 }
 0x232   : > { %v658_v1 = vadd.f32 %v657_v0, %v649_v59  ;;  %v655_v2 = vpop.permute.xlu0 %654  ;;  %v1493_v59 = vld [vmem:[%s2209_s6 + $0x58] sm:$0xff] }
 0x233   : > { %v659_v3 = vsel %vm656_vm6, %v655_v2, 0.0 }
 0x234   : > { %v660_v4 = vadd.f32 %v659_v3, %v651_v62  ;;  %661 = vrot.lane.b32.xlu1 %v658_v1, %s1611_s19  ;;  %v443_v62 = vmul.f32 512.0, %v442_v61 }
 0x236   : > { %663 = vrot.lane.b32.xlu0 %v660_v4, %s1611_s19  ;;  %1590 = vrcp.f32 %v443_v62 }
 0x243   : > { %v1937_v0 = vpop.eup %1590 }
 0x2a6   : > { %v662_v5 = vpop.permute.xlu1 %661 }
 0x2a7   : > { %v666_v7 = vsel %vm665_vm7, %v662_v5, 0.0 }
 0x2a8   : > { %v667_v8 = vadd.f32 %v666_v7, %v658_v1  ;;  %v664_v10 = vpop.permute.xlu0 %663 }
 0x2a9   : > { %v668_v12 = vsel %vm665_vm7, %v664_v10, 0.0 }
 0x2aa   : > { %v669_v13 = vadd.f32 %v668_v12, %v660_v4  ;;  %670 = vrot.lane.b32.xlu1 %v667_v8, %s1612_s20 }
 0x2ac   : > { %672 = vrot.lane.b32.xlu0 %v669_v13, %s1612_s20 }
 0x31c   : > { %v671_v14 = vpop.permute.xlu1 %670 }
 0x31d   : > { %v675_v16 = vsel %vm674_vm8, %v671_v14, 0.0 }
 0x31e   : > { %v676_v18 = vadd.f32 %v675_v16, %v667_v8  ;;  %v673_v19 = vpop.permute.xlu0 %672 }
 0x31f   : > { %v677_v21 = vsel %vm674_vm8, %v673_v19, 0.0 }
 0x320   : > { %v678_v22 = vadd.f32 %v677_v21, %v669_v13  ;;  %679 = vrot.lane.b32.xlu1 %v676_v18, %s1613_s21 }
 0x322   : > { %681 = vrot.lane.b32.xlu0 %v678_v22, %s1613_s21 }
 0x392   : > { %v680_v24 = vpop.permute.xlu1 %679 }
 0x393   : > { %v684_v25 = vsel %vm683_vm9, %v680_v24, 0.0 }
 0x394   : > { %v1853_v31 = vadd.f32 %v684_v25, %v676_v18  ;;  %v682_v32 = vpop.permute.xlu0 %681 }
 0x395   : > { %v686_v33 = vsel %vm683_vm9, %v682_v32, 0.0 }
 0x396   : > { %v1857_v35 = vadd.f32 %v686_v33, %v678_v22  ;;  %688 = vrot.lane.b32.xlu1 %v1853_v31, %s1614_s22 }
 0x398   : > { %690 = vrot.lane.b32.xlu0 %v1857_v35, %s1614_s22 }
 0x39a   : > { %722 = vperm.xlu1 %1557, %v604_v36  }
 0x39c   : > { %727 = vperm.xlu0 %1558, %v605_v37  }
 0x39e   : > { %732 = vperm.xlu1 %1557, %v606_v38  }
 0x3a0   : > { %751 = vperm.xlu0 %1558, %v609_v39  }
 0x3a2   : > { %746 = vperm.xlu1 %1557, %v608_v40  }
 0x3a4   : > { %756 = vperm.xlu0 %1558, %v610_v41  }
 0x3a6   : > { %737 = vperm.xlu1 %1557, %v607_v42  }
 0x3a8   : > { %792 = vperm.xlu0 %1558, %v782_v43  }
 0x3aa   : > { %761 = vperm.xlu1 %1557, %v611_v44  }
 0x3ac   : > { %802 = vperm.xlu0 %1558, %v784_v45  }
 0x3ae   : > { %797 = vperm.xlu1 %1557, %v783_v46  }
 0x3b0   : > { %821 = vperm.xlu0 %1558, %v769_v47  }
 0x3b2   : > { %816 = vperm.xlu1 %1557, %v768_v48  }
 0x3b4   : > { %857 = vperm.xlu0 %1558, %v1487_v49  }
 0x3b6   : > { %852 = vperm.xlu1 %1557, %v1486_v50  }
 0x3b8   : > { %826 = vperm.xlu0 %1558, %v770_v52  }
 0x3ba   : > { %807 = vperm.xlu1 %1557, %v785_v53  }
 0x3bc   : > { %900 = vperm.xlu0 %1558, %v1490_v54  }
 0x3be   : > { %862 = vperm.xlu1 %1557, %v1488_v55  }
 0x3c0   : > { %867 = vperm.xlu0 %1558, %v1489_v56  }
 0x3c2   : > { %905 = vperm.xlu1 %1557, %v1491_v57  }
 0x3c6   : > { %831 = vperm.xlu1 %1557, %v771_v20  }
 0x3ca   : > { %910 = vperm.xlu1 %1557, %v1492_v58  }
 0x3ce   : > { %915 = vperm.xlu1 %1557, %v1493_v59  }
 0x408   : > { %v689_v63 = vpop.permute.xlu1 %688 }
 0x409   : > { %v693_v1 = vsel %vm692_vm10, %v689_v63, 0.0 }
 0x40a   : > { %v694_v2 = vadd.f32 %v693_v1, %v1853_v31  ;;  %v691_v3 = vpop.permute.xlu0 %690 }
 0x40b   : > { %v695_v4 = vsel %vm692_vm10, %v691_v3, 0.0 }
 0x40c   : > { %v697_v5 = vmul.f32 %v1937_v0, %v694_v2  ;;  %v696_v7 = vadd.f32 %v695_v4, %v1857_v35 }
 0x40e   : > { %v699_v8 = vmul.f32 %v697_v5, %v697_v5  ;;  %v698_v10 = vmul.f32 %v1937_v0, %v696_v7  ;;  %v707_v19 = vrot.slane %v697_v5, %v1775_v26 }
 0x410   : > { %v700_v12 = vsub.f32 %v698_v10, %v699_v8  ;;  %v708_v24 = vsub.f32 %v1790_v15, %v707_v19  ;;  %v709_v31 = vsub.f32 %v1792_v17, %v707_v19  ;;  %v710_v32 = vsub.f32 %v1802_v30, %v707_v19 }
 0x411   : > { %v711_v41 = vsub.f32 %v1800_v28, %v707_v19 }
 0x412   : > { %v701_v13 = vmax.f32 %v700_v12, 0.0 }
 0x414   : > { %v702_v14 = vadd.f32 1e-08, %v701_v13 }
 0x415   : > { %v723_v16 = vpop.permute.xlu1 %722 }
 0x416   : > { %1592 = vrsqrt.f32 %v702_v14 }
 0x417   : > { %v728_v21 = vpop.permute.xlu0 %727 }
 0x419   : > { %v733_v18 = vpop.permute.xlu1 %732 }
 0x41b   : > { %v752_v38 = vpop.permute.xlu0 %751 }
 0x41d   : > { %v747_v33 = vpop.permute.xlu1 %746 }
 0x41f   : > { %v757_v17 = vpop.permute.xlu0 %756 }
 0x421   : > { %v738_v15 = vpop.permute.xlu1 %737 }
 0x423   : > { %v1593_v22 = vpop.eup %1592  ;;  %v793_v50 = vpop.permute.xlu0 %792 }
 0x424   : > { %v715_v25 = vrot.slane %v1593_v22, %v1775_v26 }
 0x425   : > { %v762_v47 = vpop.permute.xlu1 %761 }
 0x426   : > { %v716_v35 = vmul.f32 %v715_v25, %v708_v24  ;;  %v717_v36 = vmul.f32 %v715_v25, %v709_v31  ;;  %v718_v37 = vmul.f32 %v715_v25, %v710_v32  ;;  %v719_v45 = vmul.f32 %v715_v25, %v711_v41 }
 0x427   : > { %v803_v53 = vpop.permute.xlu0 %802  ;;  %v931_v41 = vstv %s926_s15 }
 0x428   : > { %v740_v39 = vmul.f32 %v723_v16, %v716_v35  ;;  %v741_v40 = vmul.f32 %v728_v21, %v717_v36  ;;  %v742_v42 = vmul.f32 %v733_v18, %v718_v37  ;;  %v743_v46 = vmul.f32 %v738_v15, %v719_v45 }
 0x429   : > { %v798_v48 = vpop.permute.xlu1 %797 }
 0x42a   : > { %v765_v43 = vadd.f32 %v752_v38, %v741_v40  ;;  %v764_v44 = vadd.f32 %v747_v33, %v740_v39  ;;  %v1955_v30 = vadd.f32 %v757_v17, %v742_v42  ;;  %v767_v28 = vadd.f32 %v762_v47, %v743_v46 }
 0x42b   : > { %v822_v55 = vpop.permute.xlu0 %821 }
 0x42c   : > { %774 = vrot.lane.b32.xlu0 %v765_v43, %s1608_s16  ;;  %772 = vrot.lane.b32.xlu1 %v764_v44, %s1608_s16 }
 0x42d   : > { %v817_v49 = vpop.permute.xlu1 %816 }
 0x42f   : > { %v858_v57 = vpop.permute.xlu0 %857 }
 0x430   : > { %776 = vrot.lane.b32.xlu0 %v1955_v30, %s1608_s16  ;;  %878 = vrot.lane.b32.xlu1 %v764_v44, %s1615_s8  ;;  %v871_v33 = vmul.f32 %v858_v57, %v765_v43 }
 0x431   : > { %v853_v52 = vpop.permute.xlu1 %852 }
 0x432   : > { %v870_v14 = vmul.f32 %v853_v52, %v764_v44 }
 0x433   : > { %v827_v58 = vpop.permute.xlu0 %826 }
 0x434   : > { %884 = vrot.lane.b32.xlu1 %v767_v28, %s1615_s8  ;;  %778 = vrot.lane.b32.xlu0 %v767_v28, %s1608_s16 }
 0x435   : > { %v808_v54 = vpop.permute.xlu1 %807 }
 0x437   : > { %v901_v60 = vpop.permute.xlu0 %900 }
 0x438   : > { %880 = vrot.lane.b32.xlu0 %v765_v43, %s1615_s8 }
 0x439   : > { %v863_v56 = vpop.permute.xlu1 %862 }
 0x43a   : > { %v872_v43 = vmul.f32 %v863_v56, %v1955_v30 }
 0x43b   : > { %v868_v62 = vpop.permute.xlu0 %867 }
 0x43c   : > { %882 = vrot.lane.b32.xlu0 %v1955_v30, %s1615_s8  ;;  %v873_v35 = vmul.f32 %v868_v62, %v767_v28 }
 0x43d   : > { %v906_v20 = vpop.permute.xlu1 %905 }
 0x441   : > { %v832_v59 = vpop.permute.xlu1 %831 }
 0x445   : > { %v911_v61 = vpop.permute.xlu1 %910 }
 0x449   : > { %v916_v63 = vpop.permute.xlu1 %915 }
 0x49e   : > { %v775_v1 = vpop.permute.xlu0 %774  ;;  %v773_v2 = vpop.permute.xlu1 %772 }
 0x49f   : > { %v786_v3 = vsel %vm638_vm4, %v773_v2, 0.0  ;;  %v787_v5 = vsel %vm638_vm4, %v775_v1, 0.0 }
 0x4a0   : > { %v810_v4 = vmul.f32 %v793_v50, %v786_v3  ;;  %v811_v12 = vmul.f32 %v798_v48, %v787_v5 }
 0x4a2   : > { %v777_v7 = vpop.permute.xlu0 %776  ;;  %v879_v8 = vpop.permute.xlu1 %878  ;;  %v834_v10 = vadd.f32 %v817_v49, %v810_v4  ;;  %v835_v25 = vadd.f32 %v822_v55, %v811_v12 }
 0x4a3   : > { %v894_v13 = vsel %vm887_vm11, %v879_v8, 0.0  ;;  %v788_v16 = vsel %vm638_vm4, %v777_v7, 0.0 }
 0x4a4   : > { %v874_v19 = vadd.f32 %v870_v14, %v834_v10  ;;  %v918_v21 = vmul.f32 %v901_v60, %v894_v13  ;;  %v812_v32 = vmul.f32 %v803_v53, %v788_v16  ;;  %v875_v44 = vadd.f32 %v871_v33, %v835_v25 }
 0x4a6   : > { %v779_v18 = vpop.permute.xlu0 %778  ;;  %v885_v24 = vpop.permute.xlu1 %884  ;;  %v922_v39 = vadd.f32 %v918_v21, %v874_v19  ;;  %v836_v15 = vadd.f32 %v827_v58, %v812_v32 }
 0x4a7   : > { %v789_v22 = vsel %vm638_vm4, %v779_v18, 0.0  ;;  %v897_v37 = vsel %vm887_vm11, %v885_v24, 0.0 }
 0x4a8   : > { %v813_v31 = vmul.f32 %v808_v54, %v789_v22  ;;  %v921_v17 = vmul.f32 %v916_v63, %v897_v37  ;;  %v932_v28 = vmul.f32 %v931_v41, %v922_v39  ;;  %vm927_vm12 = vcmp.gt.f32.partialorder %v922_v39, 0.0 }
 0x4a9   : > { %v876_v52 = vadd.f32 %v872_v43, %v836_v15 }
 0x4aa   : > { %v837_v36 = vadd.f32 %v832_v59, %v813_v31  ;;  %v881_v38 = vpop.permute.xlu0 %880  ;;  %v1981_v55 = vsel %vm927_vm12, %v922_v39, %v932_v28 }
 0x4ab   : > { %v895_v40 = vsel %vm887_vm11, %v881_v38, 0.0  ;;  %v957_v58 = vmul.f32 %v1981_v55, %v1981_v55 }
 0x4ac   : > { %v877_v42 = vadd.f32 %v873_v35, %v837_v36  ;;  %v919_v45 = vmul.f32 %v906_v20, %v895_v40 }
 0x4ae   : > { %v923_v46 = vadd.f32 %v919_v45, %v875_v44  ;;  %v883_v47 = vpop.permute.xlu0 %882  ;;  %v925_v48 = vadd.f32 %v921_v17, %v877_v42 }
 0x4af   : > { %v896_v49 = vsel %vm887_vm11, %v883_v47, 0.0 }
 0x4b0   : > { %vm928_vm13 = vcmp.gt.f32.partialorder %v923_v46, 0.0  ;;  %v933_v50 = vmul.f32 %v931_v41, %v923_v46  ;;  %v920_v53 = vmul.f32 %v911_v61, %v896_v49  ;;  %v935_v57 = vmul.f32 %v931_v41, %v925_v48 }
 0x4b1   : > { %vm930_vm14 = vcmp.gt.f32.partialorder %v925_v48, 0.0 }
 0x4b2   : > { %v1979_v54 = vsel %vm928_vm13, %v923_v46, %v933_v50  ;;  %v924_v20 = vadd.f32 %v920_v53, %v876_v52  ;;  %v1989_v60 = vsel %vm930_vm14, %v925_v48, %v935_v57 }
 0x4b3   : > { %v958_v30 = vmul.f32 %v1979_v54, %v1979_v54  ;;  %v948_v59 = vadd.f32 %v1979_v54, %v1981_v55  ;;  %v960_v2 = vmul.f32 %v1989_v60, %v1989_v60 }
 0x4b4   : > { %vm929_vm15 = vcmp.gt.f32.partialorder %v924_v20, 0.0  ;;  %v934_v56 = vmul.f32 %v931_v41, %v924_v20 }
 0x4b5   : > { %v961_v62 = vadd.f32 %v958_v30, %v957_v58 }
 0x4b6   : > { %v1991_v61 = vsel %vm929_vm15, %v924_v20, %v934_v56 }
 0x4b7   : > { %v949_v63 = vadd.f32 %v948_v59, %v1991_v61  ;;  %v959_v1 = vmul.f32 %v1991_v61, %v1991_v61  ;;  %v940_v59 = vld [vmem:[%s2212_s9] sm:$0xff] }
 0x4b9   : > { %v950_v3 = vadd.f32 %v949_v63, %v1989_v60  ;;  %v962_v4 = vadd.f32 %v961_v62, %v959_v1  ;;  %v941_v62 = vld [vmem:[%s2212_s9 + $0x8] sm:$0xff]  ;;  %v942_v63 = vld [vmem:[%s2212_s9 + $0x10] sm:$0xff]  ;;  %v943_v1 = vld [vmem:[%s2212_s9 + $0x18] sm:$0xff] }
 0x4bb   : > { %v951_v5 = vrot.slane %v950_v3, 4  ;;  %v963_v7 = vadd.f32 %v962_v4, %v960_v2  ;;  %v944_v2 = vld [vmem:[%s2213_s10] sm:$0xff] }
 0x4bd   : > { %v952_v8 = vadd.f32 %v951_v5, %v950_v3  ;;  %v964_v10 = vrot.slane %v963_v7, 4 }
 0x4bf   : > { %v953_v12 = vrot.slane %v952_v8, 2  ;;  %v965_v13 = vadd.f32 %v964_v10, %v963_v7 }
 0x4c1   : > { %v954_v14 = vadd.f32 %v953_v12, %v952_v8  ;;  %v966_v16 = vrot.slane %v965_v13, 2  ;;  %v946_v12 = vld [vmem:[%s2213_s10 + $0x10] sm:$0xff] }
 0x4c3   : > { %v955_v18 = vrot.slane %v954_v14, 1  ;;  %v967_v19 = vadd.f32 %v966_v16, %v965_v13  ;;  %v945_v13 = vld [vmem:[%s2213_s10 + $0x8] sm:$0xff]  ;;  %v947_v16 = vld [vmem:[%s2213_s10 + $0x18] sm:$0xff] }
 0x4c5   : > { %v956_v21 = vadd.f32 %v955_v18, %v954_v14  ;;  %v968_v22 = vrot.slane %v967_v19, 1  ;;  %v2067_v14 = vld [vmem:[%s2214_s11] sm:$0x3f] }
 0x4c6   : > { %v1098_v18 = vld [vmem:[%s2215_s12] sm:$0x3f] }
 0x4c7   : > { %970 = vrot.lane.b32.xlu0 %v956_v21, %s1608_s16  ;;  %v969_v24 = vadd.f32 %v968_v22, %v967_v19  ;;  %v1616_v19 = vmov 4   ;;  %v1619_v22 = vmov 5  }
 0x4c9   : > { %972 = vrot.lane.b32.xlu1 %v969_v24, %s1608_s16 }
 0x539   : > { %v971_v25 = vpop.permute.xlu0 %970 }
 0x53a   : > { %v974_v31 = vsel %vm638_vm4, %v971_v25, 0.0  ;;  %v1623_v25 = vmov 8  }
 0x53b   : > { %v975_v32 = vadd.f32 %v974_v31, %v956_v21  ;;  %v973_v33 = vpop.permute.xlu1 %972  ;;  %v1617_v21 = vmov 7   ;;  %v1624_v31 = vmov 19  }
 0x53c   : > { %v976_v35 = vsel %vm638_vm4, %v973_v33, 0.0  ;;  %v1626_v33 = vmov 22  }
 0x53d   : > { %v977_v36 = vadd.f32 %v976_v35, %v969_v24  ;;  %978 = vrot.lane.b32.xlu0 %v975_v32, %s1609_s17  ;;  %v1621_v24 = vmov 6   ;;  %v1627_v35 = vmov 11  }
 0x53f   : > { %980 = vrot.lane.b32.xlu1 %v977_v36, %s1609_s17 }
 0x5af   : > { %v979_v37 = vpop.permute.xlu0 %978 }
 0x5b0   : > { %v982_v38 = vsel %vm647_vm5, %v979_v37, 0.0  ;;  %v1629_v37 = vmov 12  }
 0x5b1   : > { %v983_v39 = vadd.f32 %v982_v38, %v975_v32  ;;  %v981_v40 = vpop.permute.xlu1 %980  ;;  %v1625_v32 = vmov 9   ;;  %v1630_v38 = vmov 28  }
 0x5b2   : > { %v984_v41 = vsel %vm647_vm5, %v981_v40, 0.0  ;;  %v1632_v40 = vmov 31  }
 0x5b3   : > { %v985_v42 = vadd.f32 %v984_v41, %v977_v36  ;;  %986 = vrot.lane.b32.xlu0 %v983_v39, %s1610_s18  ;;  %v1628_v36 = vmov 25   ;;  %v1633_v41 = vmov 15  }
 0x5b5   : > { %988 = vrot.lane.b32.xlu1 %v985_v42, %s1610_s18 }
 0x625   : > { %v987_v44 = vpop.permute.xlu0 %986 }
 0x626   : > { %v990_v45 = vsel %vm656_vm6, %v987_v44, 0.0  ;;  %v1635_v44 = vmov 18  }
 0x627   : > { %v991_v15 = vadd.f32 %v990_v45, %v983_v39  ;;  %v989_v17 = vpop.permute.xlu1 %988  ;;  %v1631_v39 = vmov 14   ;;  %v1636_v45 = vmov 20  }
 0x628   : > { %v992_v46 = vsel %vm656_vm6, %v989_v17, 0.0  ;;  %v1638_v17 = vmov 23  }
 0x629   : > { %v993_v47 = vadd.f32 %v992_v46, %v985_v42  ;;  %994 = vrot.lane.b32.xlu0 %v991_v15, %s1611_s19  ;;  %v1634_v42 = vmov 17   ;;  %v1639_v46 = vmov 24  }
 0x62b   : > { %996 = vrot.lane.b32.xlu1 %v993_v47, %s1611_s19  ;;  %s1485_s19 = sshll.u32 %s2218_s30, 3 }
 0x62c   : > { %s437_s24 = scalar_lea.vmem %s2216_s13, %s1485_s19 }
 0x69b   : > { %v995_v43 = vpop.permute.xlu0 %994 }
 0x69c   : > { %v998_v28 = vsel %vm665_vm7, %v995_v43, 0.0  ;;  %v1640_v43 = vmov 26  }
 0x69d   : > { %v999_v48 = vadd.f32 %v998_v28, %v991_v15  ;;  %v997_v49 = vpop.permute.xlu1 %996  ;;  %v1637_v15 = vmov 21   ;;  %v1641_v28 = vmov 27  }
 0x69e   : > { %v1000_v50 = vsel %vm665_vm7, %v997_v49, 0.0 }
 0x69f   : > { %v1001_v52 = vadd.f32 %v1000_v50, %v993_v47  ;;  %1002 = vrot.lane.b32.xlu0 %v999_v48, %s1612_s20  ;;  %v1642_v50 = vmov 29  }
 0x6a1   : > { %1004 = vrot.lane.b32.xlu1 %v1001_v52, %s1612_s20 }
 0x711   : > { %v1003_v53 = vpop.permute.xlu0 %1002 }
 0x712   : > { %v1006_v57 = vsel %vm674_vm8, %v1003_v53, 0.0 }
 0x713   : > { %v1007_v20 = vadd.f32 %v1006_v57, %v999_v48  ;;  %v1005_v30 = vpop.permute.xlu1 %1004  ;;  %v1643_v57 = vmov 30  }
 0x714   : > { %v1008_v56 = vsel %vm674_vm8, %v1005_v30, 0.0 }
 0x715   : > { %v1009_v58 = vadd.f32 %v1008_v56, %v1001_v52  ;;  %1010 = vrot.lane.b32.xlu0 %v1007_v20, %s1613_s21 }
 0x717   : > { %1012 = vrot.lane.b32.xlu1 %v1009_v58, %s1613_s21 }
 0x719   : > { %1051 = vperm.xlu0 %1558, %v940_v59  }
 0x71b   : > { %1056 = vperm.xlu1 %1557, %v941_v62  }
 0x71d   : > { %1061 = vperm.xlu0 %1558, %v942_v63  }
 0x71f   : > { %1066 = vperm.xlu1 %1557, %v943_v1  }
 0x721   : > { %1075 = vperm.xlu0 %1558, %v944_v2  }
 0x787   : > { %v1011_v3 = vpop.permute.xlu0 %1010 }
 0x788   : > { %v1014_v4 = vsel %vm683_vm9, %v1011_v3, 0.0 }
 0x789   : > { %v2048_v5 = vadd.f32 %v1014_v4, %v1007_v20  ;;  %v1013_v7 = vpop.permute.xlu1 %1012 }
 0x78a   : > { %v1016_v8 = vsel %vm683_vm9, %v1013_v7, 0.0 }
 0x78b   : > { %v2052_v10 = vadd.f32 %v1016_v8, %v1009_v58  ;;  %1018 = vrot.lane.b32.xlu0 %v2048_v5, %s1614_s22 }
 0x78d   : > { %1020 = vrot.lane.b32.xlu1 %v2052_v10, %s1614_s22 }
 0x78f   : > { %1085 = vperm.xlu0 %1558, %v946_v12  }
 0x791   : > { %1080 = vperm.xlu1 %1557, %v945_v13  }
 0x793   : > { %1101 = vperm.xlu0 %1558, %v2067_v14  }
 0x794   : > { %v1052_v47 = vpop.permute.xlu0 %1051 }
 0x795   : > { %1090 = vperm.xlu1 %1557, %v947_v16  }
 0x796   : > { %v1057_v49 = vpop.permute.xlu1 %1056 }
 0x797   : > { %1559 = vset.pattern.permute.xlu0 %v1605_v6  ;;  %v1618_v6 = vmov 10  }
 0x798   : > { %1116 = vperm.xlu0 %1559, %v2067_v14   ;;  %v2107_v48 = vpop.permute.xlu0 %1061 }
 0x799   : > { %1111 = vperm.xlu1 %1557, %v1098_v18  }
 0x79a   : > { %v1067_v53 = vpop.permute.xlu1 %1066 }
 0x79c   : > { %1562 = vset.pattern.permute.xlu0 %v1616_v19  ;;  %v1076_v52 = vpop.permute.xlu0 %1075 }
 0x79d   : > { %1560 = vset.pattern.permute.xlu1 %v1606_v9  ;;  %1146 = vperm.xlu0 %1562, %v2067_v14   ;;  %v1620_v9 = vmov 13  }
 0x79e   : > { %1126 = vperm.xlu1 %1560, %v2067_v14  }
 0x7a1   : > { %1565 = vset.pattern.permute.xlu0 %v1617_v21 }
 0x7a2   : > { %1561 = vset.pattern.permute.xlu1 %v1607_v11  ;;  %1176 = vperm.xlu0 %1565, %v2067_v14   ;;  %v1622_v11 = vmov 16  }
 0x7a3   : > { %1136 = vperm.xlu1 %1561, %v2067_v14  }
 0x7a6   : > { %1568 = vset.pattern.permute.xlu0 %v1618_v6 }
 0x7a7   : > { %1563 = vset.pattern.permute.xlu1 %v1619_v22  ;;  %1206 = vperm.xlu0 %1568, %v2067_v14  }
 0x7a8   : > { %1156 = vperm.xlu1 %1563, %v2067_v14  }
 0x7ab   : > { %1571 = vset.pattern.permute.xlu0 %v1620_v9 }
 0x7ac   : > { %1564 = vset.pattern.permute.xlu1 %v1621_v24  ;;  %1236 = vperm.xlu0 %1571, %v2067_v14  }
 0x7ad   : > { %1166 = vperm.xlu1 %1564, %v2067_v14  }
 0x7b0   : > { %1574 = vset.pattern.permute.xlu0 %v1622_v11 }
 0x7b1   : > { %1566 = vset.pattern.permute.xlu1 %v1623_v25  ;;  %1266 = vperm.xlu0 %1574, %v2067_v14  }
 0x7b2   : > { %1186 = vperm.xlu1 %1566, %v2067_v14  }
 0x7b5   : > { %1577 = vset.pattern.permute.xlu0 %v1624_v31 }
 0x7b6   : > { %1567 = vset.pattern.permute.xlu1 %v1625_v32  ;;  %1296 = vperm.xlu0 %1577, %v2067_v14  }
 0x7b7   : > { %1196 = vperm.xlu1 %1567, %v2067_v14  }
 0x7ba   : > { %1580 = vset.pattern.permute.xlu0 %v1626_v33 }
 0x7bb   : > { %1569 = vset.pattern.permute.xlu1 %v1627_v35  ;;  %1326 = vperm.xlu0 %1580, %v2067_v14  }
 0x7bc   : > { %1216 = vperm.xlu1 %1569, %v2067_v14  }
 0x7bf   : > { %1583 = vset.pattern.permute.xlu0 %v1628_v36  ;;  %v2142_v36 = vsub.s32 4, %v1769_v23 }
 0x7c0   : > { %1570 = vset.pattern.permute.xlu1 %v1629_v37  ;;  %1356 = vperm.xlu0 %1583, %v2067_v14  }
 0x7c1   : > { %1226 = vperm.xlu1 %1570, %v2067_v14  }
 0x7c4   : > { %1586 = vset.pattern.permute.xlu0 %v1630_v38 }
 0x7c5   : > { %1572 = vset.pattern.permute.xlu1 %v1631_v39  ;;  %1386 = vperm.xlu0 %1586, %v2067_v14  }
 0x7c6   : > { %1246 = vperm.xlu1 %1572, %v2067_v14  }
 0x7c9   : > { %1589 = vset.pattern.permute.xlu0 %v1632_v40 }
 0x7ca   : > { %1573 = vset.pattern.permute.xlu1 %v1633_v41  ;;  %1416 = vperm.xlu0 %1589, %v2067_v14  }
 0x7cb   : > { %1256 = vperm.xlu1 %1573, %v2067_v14  }
 0x7cf   : > { %1575 = vset.pattern.permute.xlu1 %v1634_v42  ;;  %v2147_v42 = vsub.s32 5, %v1769_v23 }
 0x7d0   : > { %1276 = vperm.xlu1 %1575, %v2067_v14  }
 0x7d4   : > { %1576 = vset.pattern.permute.xlu1 %v1635_v44 }
 0x7d5   : > { %1286 = vperm.xlu1 %1576, %v2067_v14  }
 0x7d9   : > { %1578 = vset.pattern.permute.xlu1 %v1636_v45 }
 0x7da   : > { %1306 = vperm.xlu1 %1578, %v2067_v14  }
 0x7de   : > { %1579 = vset.pattern.permute.xlu1 %v1637_v15 }
 0x7df   : > { %1316 = vperm.xlu1 %1579, %v2067_v14  }
 0x7e3   : > { %1581 = vset.pattern.permute.xlu1 %v1638_v17 }
 0x7e4   : > { %1336 = vperm.xlu1 %1581, %v2067_v14  }
 0x7e8   : > { %1582 = vset.pattern.permute.xlu1 %v1639_v46  ;;  %v2151_v46 = vsub.s32 7, %v1769_v23 }
 0x7e9   : > { %1346 = vperm.xlu1 %1582, %v2067_v14  }
 0x7ed   : > { %1584 = vset.pattern.permute.xlu1 %v1640_v43 }
 0x7ee   : > { %1366 = vperm.xlu1 %1584, %v2067_v14  }
 0x7f2   : > { %1585 = vset.pattern.permute.xlu1 %v1641_v28 }
 0x7f3   : > { %1376 = vperm.xlu1 %1585, %v2067_v14  }
 0x7f7   : > { %1587 = vset.pattern.permute.xlu1 %v1642_v50 }
 0x7f8   : > { %1396 = vperm.xlu1 %1587, %v2067_v14  }
 0x7fc   : > { %1588 = vset.pattern.permute.xlu1 %v1643_v57 }
 0x7fd   : > { %1406 = vperm.xlu1 %1588, %v2067_v14   ;;  %v1019_v20 = vpop.permute.xlu0 %1018 }
 0x7fe   : > { %v1022_v30 = vsel %vm692_vm10, %v1019_v20, 0.0 }
 0x7ff   : > { %v1023_v56 = vadd.f32 %v1022_v30, %v2048_v5  ;;  %v1021_v58 = vpop.permute.xlu1 %1020 }
 0x800   : > { %v1024_v59 = vsel %vm692_vm10, %v1021_v58, 0.0 }
 0x801   : > { %v1026_v62 = vmul.f32 %v1937_v0, %v1023_v56  ;;  %v1025_v63 = vadd.f32 %v1024_v59, %v2052_v10 }
 0x803   : > { %v1028_v1 = vmul.f32 %v1026_v62, %v1026_v62  ;;  %v1027_v2 = vmul.f32 %v1937_v0, %v1025_v63  ;;  %v2121_v5 = vrot.slane %v1026_v62, %v1775_v26 }
 0x805   : > { %v1029_v3 = vsub.f32 %v1027_v2, %v1028_v1  ;;  %v1037_v16 = vsub.f32 %v1981_v55, %v2121_v5  ;;  %v1040_v0 = vsub.f32 %v1989_v60, %v2121_v5  ;;  %v1038_v32 = vsub.f32 %v1979_v54, %v2121_v5 }
 0x807   : > { %v1030_v4 = vmax.f32 %v1029_v3, 0.0 }
 0x809   : > { %v1031_v7 = vadd.f32 1e-08, %v1030_v4 }
 0x80a   : > { %v2123_v51 = vpop.permute.xlu0 %1085 }
 0x80b   : > { %1594 = vrsqrt.f32 %v1031_v7 }
 0x80c   : > { %v1081_v8 = vpop.permute.xlu1 %1080 }
 0x80e   : > { %v1102_v9 = vpop.permute.xlu0 %1101 }
 0x810   : > { %v1091_v12 = vpop.permute.xlu1 %1090 }
 0x813   : > { %v1117_v60 = vpop.permute.xlu0 %1116 }
 0x814   : > { %v1112_v13 = vpop.permute.xlu1 %1111 }
 0x818   : > { %v1595_v14 = vpop.eup %1594  ;;  %v1147_v17 = vpop.permute.xlu0 %1146 }
 0x819   : > { %v2128_v10 = vrot.slane %v1595_v14, %v1775_v26  ;;  %v1127_v18 = vpop.permute.xlu1 %1126 }
 0x81b   : > { %v1045_v19 = vmul.f32 %v2128_v10, %v1037_v16  ;;  %v1048_v21 = vmul.f32 %v2128_v10, %v1040_v0  ;;  %v1046_v38 = vmul.f32 %v2128_v10, %v1038_v32 }
 0x81d   : > { %v1069_v6 = vmul.f32 %v1052_v47, %v1045_v19  ;;  %v1072_v22 = vmul.f32 %v1067_v53, %v1048_v21  ;;  %v1070_v15 = vmul.f32 %v1057_v49, %v1046_v38  ;;  %v1177_v62 = vpop.permute.xlu0 %1176 }
 0x81e   : > { %v1137_v24 = vpop.permute.xlu1 %1136 }
 0x81f   : > { %v1093_v11 = vadd.f32 %v1076_v52, %v1069_v6  ;;  %v2134_v25 = vadd.f32 %v1091_v12, %v1072_v22  ;;  %v2155_v52 = vsub.s32 6, %v1769_v23  ;;  %v1094_v20 = vadd.f32 %v1081_v8, %v1070_v15 }
 0x821   : > { %v1107_v55 = vrot.slane %v1093_v11, %v1775_v26  ;;  %v1122_v31 = vrot.slane %v1093_v11, %v1778_v27  ;;  %v1132_v35 = vrot.slane %v1093_v11, %v1781_v29  ;;  %v1142_v41 = vrot.slane %v1093_v11, %v1786_v34 }
 0x822   : > { %v1152_v54 = vrot.slane %v1093_v11, %v2142_v36  ;;  %v1162_v50 = vrot.slane %v1093_v11, %v2147_v42  ;;  %v1182_v30 = vrot.slane %v1093_v11, %v2151_v46  ;;  %v1172_v49 = vrot.slane %v1093_v11, %v2155_v52  ;;  %v1207_v14 = vpop.permute.xlu0 %1206 }
 0x823   : > { %v1108_v33 = vmul.f32 %v1107_v55, %v1102_v9  ;;  %v1157_v37 = vpop.permute.xlu1 %1156  ;;  %v1123_v40 = vmul.f32 %v1122_v31, %v1117_v60  ;;  %v1133_v45 = vmul.f32 %v1132_v35, %v1127_v18  ;;  %v1143_v28 = vmul.f32 %v1142_v41, %v1137_v24 }
 0x824   : > { %v1153_v53 = vmul.f32 %v1152_v54, %v1147_v17  ;;  %v1163_v58 = vmul.f32 %v1162_v50, %v1157_v37  ;;  %v1183_v2 = vmul.f32 %v1182_v30, %v1177_v62  ;;  %v1192_v4 = vrot.slane %v1094_v20, %v1775_v26 }
 0x825   : > { %v1114_v39 = vadd.f32 %v1112_v13, %v1108_v33  ;;  %v1212_v23 = vrot.slane %v1094_v20, %v1781_v29  ;;  %v1202_v8 = vrot.slane %v1094_v20, %v1778_v27  ;;  %v1222_v6 = vrot.slane %v1094_v20, %v1786_v34 }
 0x826   : > { %v1039_v24 = vsub.f32 %v1991_v61, %v2121_v5  ;;  %v1232_v11 = vrot.slane %v1094_v20, %v2142_v36  ;;  %v1242_v35 = vrot.slane %v1094_v20, %v2147_v42  ;;  %v1252_v41 = vrot.slane %v1094_v20, %v2155_v52 }
 0x827   : > { %v1124_v44 = vadd.f32 %v1123_v40, %v1114_v39  ;;  %v1213_v18 = vmul.f32 %v1212_v23, %v1207_v14  ;;  %v1237_v33 = vpop.permute.xlu0 %1236  ;;  %v1262_v5 = vrot.slane %v1094_v20, %v2151_v46 }
 0x828   : > { %v1167_v47 = vpop.permute.xlu1 %1166  ;;  %v1047_v31 = vmul.f32 %v2128_v10, %v1039_v24  ;;  %v1243_v39 = vmul.f32 %v1242_v35, %v1237_v33  ;;  %v1372_v33 = vrot.slane %v2134_v25, %v1781_v29 }
 0x829   : > { %v1134_v43 = vadd.f32 %v1133_v45, %v1124_v44  ;;  %v1173_v1 = vmul.f32 %v1172_v49, %v1167_v47 }
 0x82a   : > { %v1071_v38 = vmul.f32 %v2107_v48, %v1047_v31 }
 0x82b   : > { %v1144_v57 = vadd.f32 %v1143_v28, %v1134_v43 }
 0x82c   : > { %v1095_v61 = vadd.f32 %v2123_v51, %v1071_v38  ;;  %v1267_v17 = vpop.permute.xlu0 %1266  ;;  %v1382_v38 = vrot.slane %v2134_v25, %v1786_v34 }
 0x82d   : > { %v1154_v56 = vadd.f32 %v1153_v53, %v1144_v57  ;;  %v1187_v59 = vpop.permute.xlu1 %1186 }
 0x82e   : > { %v1193_v13 = vmul.f32 %v1192_v4, %v1187_v59  ;;  %v1272_v47 = vrot.slane %v1095_v61, %v1775_v26  ;;  %v1282_v48 = vrot.slane %v1095_v61, %v1778_v27  ;;  %v1292_v30 = vrot.slane %v1095_v61, %v1781_v29 }
 0x82f   : > { %v1164_v63 = vadd.f32 %v1163_v58, %v1154_v56  ;;  %v1302_v20 = vrot.slane %v1095_v61, %v1786_v34  ;;  %v1322_v4 = vrot.slane %v1095_v61, %v2147_v42 }
 0x830   : > { %v1273_v28 = vmul.f32 %v1272_v47, %v1267_v17  ;;  %v1422_v17 = vrot.slane %v2134_v25, %v2151_v46 }
 0x831   : > { %v1174_v3 = vadd.f32 %v1173_v1, %v1164_v63  ;;  %v1297_v49 = vpop.permute.xlu0 %1296  ;;  %v1312_v1 = vrot.slane %v1095_v61, %v2142_v36 }
 0x832   : > { %v1197_v7 = vpop.permute.xlu1 %1196  ;;  %v1303_v62 = vmul.f32 %v1302_v20, %v1297_v49 }
 0x833   : > { %v1184_v12 = vadd.f32 %v1183_v2, %v1174_v3  ;;  %v1203_v0 = vmul.f32 %v1202_v8, %v1197_v7  ;;  %v1332_v8 = vrot.slane %v1095_v61, %v2155_v52 }
 0x835   : > { %v1194_v16 = vadd.f32 %v1193_v13, %v1184_v12 }
 0x836   : > { %v1327_v13 = vpop.permute.xlu0 %1326 }
 0x837   : > { %v1204_v19 = vadd.f32 %v1203_v0, %v1194_v16  ;;  %v1217_v21 = vpop.permute.xlu1 %1216  ;;  %v1333_v16 = vmul.f32 %v1332_v8, %v1327_v13 }
 0x838   : > { %v1223_v9 = vmul.f32 %v1222_v6, %v1217_v21  ;;  %v1352_v6 = vrot.slane %v2134_v25, %v1775_v26 }
 0x839   : > { %v1214_v22 = vadd.f32 %v1213_v18, %v1204_v19  ;;  %v1342_v18 = vrot.slane %v1095_v61, %v2151_v46 }
 0x83b   : > { %v1224_v32 = vadd.f32 %v1223_v9, %v1214_v22 }
 0x83c   : > { %v1227_v55 = vpop.permute.xlu1 %1226 }
 0x83d   : > { %v1233_v60 = vmul.f32 %v1232_v11, %v1227_v55  ;;  %v1357_v11 = vpop.permute.xlu0 %1356  ;;  %v1362_v55 = vrot.slane %v2134_v25, %v1778_v27 }
 0x83f   : > { %v1234_v37 = vadd.f32 %v1233_v60, %v1224_v32  ;;  %v1363_v32 = vmul.f32 %v1362_v55, %v1357_v11 }
 0x841   : > { %v1247_v40 = vpop.permute.xlu1 %1246  ;;  %v1244_v44 = vadd.f32 %v1243_v39, %v1234_v37 }
 0x842   : > { %v1253_v45 = vmul.f32 %v1252_v41, %v1247_v40  ;;  %v1387_v41 = vpop.permute.xlu0 %1386 }
 0x844   : > { %v1254_v10 = vadd.f32 %v1253_v45, %v1244_v44  ;;  %v1392_v44 = vrot.slane %v2134_v25, %v2142_v36 }
 0x846   : > { %v1257_v54 = vpop.permute.xlu1 %1256  ;;  %v1393_v45 = vmul.f32 %v1392_v44, %v1387_v41  ;;  %v1417_v34 = vpop.permute.xlu0 %1416 }
 0x847   : > { %v1263_v15 = vmul.f32 %v1262_v5, %v1257_v54  ;;  %v1402_v5 = vrot.slane %v2134_v25, %v2147_v42  ;;  %v1423_v36 = vmul.f32 %v1422_v17, %v1417_v34 }
 0x849   : > { %v1264_v43 = vadd.f32 %v1263_v15, %v1254_v10  ;;  %v1412_v10 = vrot.slane %v2134_v25, %v2155_v52 }
 0x84b   : > { %v1277_v50 = vpop.permute.xlu1 %1276  ;;  %v1274_v53 = vadd.f32 %v1273_v28, %v1264_v43 }
 0x84c   : > { %v1283_v57 = vmul.f32 %v1282_v48, %v1277_v50 }
 0x84e   : > { %v1284_v58 = vadd.f32 %v1283_v57, %v1274_v53 }
 0x850   : > { %v1287_v56 = vpop.permute.xlu1 %1286 }
 0x851   : > { %v1293_v51 = vmul.f32 %v1292_v30, %v1287_v56 }
 0x853   : > { %v1294_v59 = vadd.f32 %v1293_v51, %v1284_v58 }
 0x855   : > { %v1307_v63 = vpop.permute.xlu1 %1306  ;;  %v1304_v2 = vadd.f32 %v1303_v62, %v1294_v59 }
 0x856   : > { %v1313_v3 = vmul.f32 %v1312_v1, %v1307_v63 }
 0x858   : > { %v1314_v23 = vadd.f32 %v1313_v3, %v1304_v2 }
 0x85a   : > { %v1317_v7 = vpop.permute.xlu1 %1316 }
 0x85b   : > { %v1323_v12 = vmul.f32 %v1322_v4, %v1317_v7 }
 0x85d   : > { %v1324_v14 = vadd.f32 %v1323_v12, %v1314_v23 }
 0x85f   : > { %v1337_v0 = vpop.permute.xlu1 %1336  ;;  %v1334_v19 = vadd.f32 %v1333_v16, %v1324_v14 }
 0x860   : > { %v1343_v21 = vmul.f32 %v1342_v18, %v1337_v0 }
 0x862   : > { %v1344_v9 = vadd.f32 %v1343_v21, %v1334_v19 }
 0x864   : > { %v1347_v22 = vpop.permute.xlu1 %1346 }
 0x865   : > { %v1353_v24 = vmul.f32 %v1352_v6, %v1347_v22 }
 0x867   : > { %v1354_v31 = vadd.f32 %v1353_v24, %v1344_v9 }
 0x869   : > { %v1367_v60 = vpop.permute.xlu1 %1366  ;;  %v1364_v35 = vadd.f32 %v1363_v32, %v1354_v31 }
 0x86a   : > { %v1373_v37 = vmul.f32 %v1372_v33, %v1367_v60 }
 0x86c   : > { %v1374_v26 = vadd.f32 %v1373_v37, %v1364_v35 }
 0x86e   : > { %v1377_v39 = vpop.permute.xlu1 %1376 }
 0x86f   : > { %v1383_v40 = vmul.f32 %v1382_v38, %v1377_v39 }
 0x871   : > { %v1384_v27 = vadd.f32 %v1383_v40, %v1374_v26 }
 0x873   : > { %v1397_v61 = vpop.permute.xlu1 %1396  ;;  %v1394_v29 = vadd.f32 %v1393_v45, %v1384_v27 }
 0x874   : > { %v1403_v54 = vmul.f32 %v1402_v5, %v1397_v61 }
 0x876   : > { %v1404_v47 = vadd.f32 %v1403_v54, %v1394_v29 }
 0x878   : > { %v1407_v15 = vpop.permute.xlu1 %1406 }
 0x879   : > { %v1413_v43 = vmul.f32 %v1412_v10, %v1407_v15 }
 0x87b   : > { %v1414_v28 = vadd.f32 %v1413_v43, %v1404_v47 }
 0x87d   : > { %v1424_v42 = vadd.f32 %v1423_v36, %v1414_v28 }
 0x87f   : > { %1425 = vst [vmem:[%s437_s24] sm:$0x3f] %v1424_v42 }
 0x880 PF: > { %s25_s29 = sadd.s32 1, %s1602_s29  }
 0x881   : > { %p22_p4 = scmp.ge.s32.totalorder %s25_s29, 4  }
 0x883   :  { %24 = sbr.rel (!%p22_p4) target bundleno = 3 (0x3), region = 104 }

</bundles_post_ra>
